<compile_context>
chip_gen: v7x
topology: tpu7x:2x2x1
jax: 0.10.0
libtpu: 0.0.40
codegen_flags: <defaults>
</compile_context>

<pallas_src>
import numpy as np
import jax
import jax.numpy as jnp
from jax.experimental import pallas as pl
from jax.experimental.pallas import tpu as pltpu


def _round_up(v, m):
    return ((v + m - 1) // m) * m


def _dft_matrices(H, W, Wcp):
    """Host (numpy) constants for the fused DFT matmuls.

    FW = [fw_re | fw_im]   shape (W, 2*Wcp), columns [Wc:Wcp] zero-padded.
    FH = [[fh_re];[fh_im]] shape (2H, H).
    Convention matches rfft2(norm='backward'): exp(-2*pi*i*n*k/N).
    """
    Wc = W // 2 + 1
    n_w = np.arange(W, dtype=np.float64)[:, None]
    k_w = np.arange(Wc, dtype=np.float64)[None, :]
    ang_w = 2.0 * np.pi * n_w * k_w / W
    fw = np.zeros((W, 2 * Wcp), dtype=np.float32)
    fw[:, :Wc] = np.cos(ang_w)
    fw[:, Wcp:Wcp + Wc] = -np.sin(ang_w)

    k_h = np.arange(H, dtype=np.float64)[:, None]
    n_h = np.arange(H, dtype=np.float64)[None, :]
    ang_h = 2.0 * np.pi * k_h * n_h / H
    fh = np.concatenate([np.cos(ang_h), -np.sin(ang_h)], axis=0).astype(np.float32)
    return jnp.asarray(fw), jnp.asarray(fh)


def _make_amp_loss_kernel(TN, H, Wcp, inv_total):
    def kernel(x_ref, y_ref, fw_ref, fh_ref, out_ref, acc_ref):
        n = pl.program_id(0)

        @pl.when(n == 0)
        def _():
            acc_ref[...] = jnp.zeros_like(acc_ref)

        fw = fw_ref[...]                                         # (W, 2*Wcp)
        # Hoisted once per step; reused for both x and y transforms.
        fh_b = jnp.broadcast_to(fh_ref[...], (TN, 2 * H, H))     # (TN, 2H, H)

        def rfft2_mag(img):                                      # img: (TN, H, W)
            W = img.shape[-1]
            # Width rfft: one large lane-dense matmul.
            q1 = jnp.dot(img.reshape(TN * H, W), fw,
                         preferred_element_type=jnp.float32)     # (TN*H, 2*Wcp)
            q1 = q1.reshape(TN, H, 2 * Wcp)
            # Height fft: one batched matmul (canonical 'bij,bjk->bik' form).
            q = jnp.einsum('bkh,bhw->bkw', fh_b, q1,
                           preferred_element_type=jnp.float32)   # (TN, 2H, 2*Wcp)
            # Quadrant recovery (tile-aligned slices: H % 8 == 0, Wcp % 128 == 0).
            yr = q[:, :H, :Wcp] - q[:, H:, Wcp:]
            yi = q[:, :H, Wcp:] + q[:, H:, :Wcp]
            return jnp.sqrt(yr * yr + yi * yi)                   # (TN, H, Wcp)

        d = jnp.abs(rfft2_mag(x_ref[...]) - rfft2_mag(y_ref[...]))
        # VPU-only partial accumulation (reduce over the leading batch axis);
        # padded lanes contribute exact zeros so the sum is unchanged.
        acc_ref[...] += jnp.sum(d, axis=0)                       # (H, Wcp)

        @pl.when(n == pl.num_programs(0) - 1)
        def _():
            out_ref[...] = jnp.sum(acc_ref[...], keepdims=True) * inv_total

    return kernel


def _choose_tn(N, H, W, budget_bytes=512 * 1024):
    """Largest divisor of N whose (TN, H, W) f32 block stays under the budget."""
    per_img = H * W * 4
    cap = max(1, budget_bytes // per_img)
    tn = 1
    for d in range(1, N + 1):
        if N % d == 0 and d <= cap:
            tn = d
    return tn


def amp_loss(x, y):
    """x, y: (B, C, H, W) float32 (NCHW).  Returns scalar float32 loss."""
    B, C, H, W = x.shape
    assert y.shape == x.shape
    Wc = W // 2 + 1
    Wcp = _round_up(Wc, 128)          # lane-dense padded rfft width
    N = B * C
    TN = _choose_tn(N, H, W)

    x2 = x.reshape(N, H, W).astype(jnp.float32)
    y2 = y.reshape(N, H, W).astype(jnp.float32)
    fw, fh = _dft_matrices(H, W, Wcp)

    inv_total = 1.0 / float(N * H * Wc)   # TRUE (unpadded) element count
    kernel = _make_amp_loss_kernel(TN, H, Wcp, inv_total)

    img_spec = pl.BlockSpec((TN, H, W), lambda n: (n, 0, 0))
    fw_spec = pl.BlockSpec((W, 2 * Wcp), lambda n: (0, 0))
    fh_spec = pl.BlockSpec((2 * H, H), lambda n: (0, 0))

    out = pl.pallas_call(
        kernel,
        out_shape=jax.ShapeDtypeStruct((1, 1), jnp.float32),
        grid_spec=pltpu.PrefetchScalarGridSpec(
            num_scalar_prefetch=0,
            grid=(N // TN,),
            in_specs=[img_spec, img_spec, fw_spec, fh_spec],
            out_specs=pl.BlockSpec((1, 1), lambda n: (0, 0)),
            scratch_shapes=[pltpu.VMEM((H, Wcp), jnp.float32)],
        ),
        compiler_params=pltpu.CompilerParams(
            dimension_semantics=("arbitrary",),
            vmem_limit_bytes=48 * 1024 * 1024,
        ),
    )(x2, y2, fw, fh)
    return out[0, 0]


if __name__ == "__main__":
    key = jax.random.PRNGKey(0)
    kx, ky = jax.random.split(key)
    B, C, H, W = 2, 4, 16, 16
    x = jax.random.normal(kx, (B, C, H, W), dtype=jnp.float32)
    y = jax.random.normal(ky, (B, C, H, W), dtype=jnp.float32)

    loss = jax.block_until_ready(amp_loss(x, y))

    # Pure-JAX reference (rfft2 default norm == 'backward').
    ref = jnp.mean(jnp.abs(jnp.abs(jnp.fft.rfft2(x)) - jnp.abs(jnp.fft.rfft2(y))))
    assert jnp.allclose(loss, ref, rtol=1e-4, atol=1e-4), (loss, ref)

    print("KERNEL_OK")
</pallas_src>

<mosaic_0001>
module attributes {stable_mosaic.version = 11 : i64} {
  func.func @kernel(%arg0: i32, %arg1: memref<8x16x16xf32, #tpu.memory_space<vmem>>, %arg2: memref<8x16x16xf32, #tpu.memory_space<vmem>>, %arg3: memref<16x256xf32, #tpu.memory_space<vmem>>, %arg4: memref<32x16xf32, #tpu.memory_space<vmem>>, %arg5: memref<1x1xf32, #tpu.memory_space<vmem>>, %arg6: memref<16x128xf32, #tpu.memory_space<vmem>>) attributes {dimension_semantics = [#tpu.dimension_semantics<arbitrary>], iteration_bounds = array<i64: 1>, scalar_prefetch = 0 : i64, scratch_operands = 1 : i64, tpu.core_type = #tpu.core_type<tc>, window_params = [{transform_indices = @transform_0, window_bounds = array<i64: 8, 16, 16>}, {transform_indices = @transform_1, window_bounds = array<i64: 8, 16, 16>}, {pipeline_mode = #tpu.pipeline_mode<synchronous>, transform_indices = @transform_2, window_bounds = array<i64: 16, 256>}, {pipeline_mode = #tpu.pipeline_mode<synchronous>, transform_indices = @transform_3, window_bounds = array<i64: 32, 16>}, {pipeline_mode = #tpu.pipeline_mode<synchronous>, transform_indices = @transform_4, window_bounds = array<i64: 1, 1>}]} {
    %c0_i32 = arith.constant 0 : i32
    %0 = arith.cmpi eq, %arg0, %c0_i32 : i32
    %1 = arith.extui %0 : i1 to i32
    %c0_i32_0 = arith.constant 0 : i32
    %2 = arith.cmpi ne, %1, %c0_i32_0 : i32
    scf.if %2 {
      %cst_20 = arith.constant 0.000000e+00 : f32
      %46 = vector.broadcast %cst_20 : f32 to vector<16x128xf32>
      %c0_21 = arith.constant 0 : index
      %c0_22 = arith.constant 0 : index
      %47 = vector.load %arg6[%c0_21, %c0_22] : memref<16x128xf32, #tpu.memory_space<vmem>>, vector<16x128xf32>
      tpu.vector_store %arg6[%c0_21, %c0_22], %46 {strides = array<i32>} : memref<16x128xf32, #tpu.memory_space<vmem>>, vector<16x128xf32>,
    } else {
    }
    %c0 = arith.constant 0 : index
    %c0_1 = arith.constant 0 : index
    %3 = vector.load %arg3[%c0, %c0_1] : memref<16x256xf32, #tpu.memory_space<vmem>>, vector<16x256xf32>
    %c0_2 = arith.constant 0 : index
    %c0_3 = arith.constant 0 : index
    %4 = vector.load %arg4[%c0_2, %c0_3] : memref<32x16xf32, #tpu.memory_space<vmem>>, vector<32x16xf32>
    %5 = vector.shape_cast %4 : vector<32x16xf32> to vector<1x32x16xf32>
    %6 = vector.broadcast %5 : vector<1x32x16xf32> to vector<8x32x16xf32>
    %c0_4 = arith.constant 0 : index
    %c0_5 = arith.constant 0 : index
    %c0_6 = arith.constant 0 : index
    %7 = vector.load %arg1[%c0_4, %c0_5, %c0_6] : memref<8x16x16xf32, #tpu.memory_space<vmem>>, vector<8x16x16xf32>
    %8 = vector.shape_cast %7 : vector<8x16x16xf32> to vector<128x16xf32>
    %cst = arith.constant dense<0.000000e+00> : vector<128x256xf32>
    %9 = tpu.matmul %8, %3, %cst {dimension_numbers = #tpu.dot_dimension_numbers<[1], [0], [0], [1], [0, 0, 1, 1], [], []>} : vector<128x16xf32>, vector<16x256xf32>, vector<128x256xf32> -> vector<128x256xf32>
    %10 = vector.shape_cast %9 : vector<128x256xf32> to vector<8x16x256xf32>
    "tpu.trace_start"() <{level = 10 : i32, message = "bkh,bhw->bkw"}> : () -> ()
    %cst_7 = arith.constant dense<0.000000e+00> : vector<8x32x256xf32>
    %11 = tpu.matmul %6, %10, %cst_7 {dimension_numbers = #tpu.dot_dimension_numbers<[2], [1], [1], [2], [0, 0, 0, 1, 1, 2], [0], [0]>} : vector<8x32x16xf32>, vector<8x16x256xf32>, vector<8x32x256xf32> -> vector<8x32x256xf32>
    "tpu.trace_stop"() : () -> ()
    %12 = vector.extract_strided_slice %11 {offsets = [0, 0, 0], sizes = [8, 16, 128], strides = [1, 1, 1]} : vector<8x32x256xf32> to vector<8x16x128xf32>
    %13 = vector.extract_strided_slice %11 {offsets = [0, 16, 128], sizes = [8, 16, 128], strides = [1, 1, 1]} : vector<8x32x256xf32> to vector<8x16x128xf32>
    %14 = arith.subf %12, %13 : vector<8x16x128xf32>
    %15 = vector.extract_strided_slice %11 {offsets = [0, 0, 128], sizes = [8, 16, 128], strides = [1, 1, 1]} : vector<8x32x256xf32> to vector<8x16x128xf32>
    %16 = vector.extract_strided_slice %11 {offsets = [0, 16, 0], sizes = [8, 16, 128], strides = [1, 1, 1]} : vector<8x32x256xf32> to vector<8x16x128xf32>
    %17 = arith.addf %15, %16 : vector<8x16x128xf32>
    %18 = arith.mulf %14, %14 : vector<8x16x128xf32>
    %19 = arith.mulf %17, %17 : vector<8x16x128xf32>
    %20 = arith.addf %18, %19 : vector<8x16x128xf32>
    %21 = math.sqrt %20 : vector<8x16x128xf32>
    %c0_8 = arith.constant 0 : index
    %c0_9 = arith.constant 0 : index
    %c0_10 = arith.constant 0 : index
    %22 = vector.load %arg2[%c0_8, %c0_9, %c0_10] : memref<8x16x16xf32, #tpu.memory_space<vmem>>, vector<8x16x16xf32>
    %23 = vector.shape_cast %22 : vector<8x16x16xf32> to vector<128x16xf32>
    %cst_11 = arith.constant dense<0.000000e+00> : vector<128x256xf32>
    %24 = tpu.matmul %23, %3, %cst_11 {dimension_numbers = #tpu.dot_dimension_numbers<[1], [0], [0], [1], [0, 0, 1, 1], [], []>} : vector<128x16xf32>, vector<16x256xf32>, vector<128x256xf32> -> vector<128x256xf32>
    %25 = vector.shape_cast %24 : vector<128x256xf32> to vector<8x16x256xf32>
    "tpu.trace_start"() <{level = 10 : i32, message = "bkh,bhw->bkw"}> : () -> ()
    %cst_12 = arith.constant dense<0.000000e+00> : vector<8x32x256xf32>
    %26 = tpu.matmul %6, %25, %cst_12 {dimension_numbers = #tpu.dot_dimension_numbers<[2], [1], [1], [2], [0, 0, 0, 1, 1, 2], [0], [0]>} : vector<8x32x16xf32>, vector<8x16x256xf32>, vector<8x32x256xf32> -> vector<8x32x256xf32>
    "tpu.trace_stop"() : () -> ()
    %27 = vector.extract_strided_slice %26 {offsets = [0, 0, 0], sizes = [8, 16, 128], strides = [1, 1, 1]} : vector<8x32x256xf32> to vector<8x16x128xf32>
    %28 = vector.extract_strided_slice %26 {offsets = [0, 16, 128], sizes = [8, 16, 128], strides = [1, 1, 1]} : vector<8x32x256xf32> to vector<8x16x128xf32>
    %29 = arith.subf %27, %28 : vector<8x16x128xf32>
    %30 = vector.extract_strided_slice %26 {offsets = [0, 0, 128], sizes = [8, 16, 128], strides = [1, 1, 1]} : vector<8x32x256xf32> to vector<8x16x128xf32>
    %31 = vector.extract_strided_slice %26 {offsets = [0, 16, 0], sizes = [8, 16, 128], strides = [1, 1, 1]} : vector<8x32x256xf32> to vector<8x16x128xf32>
    %32 = arith.addf %30, %31 : vector<8x16x128xf32>
    %33 = arith.mulf %29, %29 : vector<8x16x128xf32>
    %34 = arith.mulf %32, %32 : vector<8x16x128xf32>
    %35 = arith.addf %33, %34 : vector<8x16x128xf32>
    %36 = math.sqrt %35 : vector<8x16x128xf32>
    %37 = arith.subf %21, %36 : vector<8x16x128xf32>
    %38 = math.absf %37 : vector<8x16x128xf32>
    %c0_13 = arith.constant 0 : index
    %c0_14 = arith.constant 0 : index
    %39 = vector.load %arg6[%c0_13, %c0_14] : memref<16x128xf32, #tpu.memory_space<vmem>>, vector<16x128xf32>
    %cst_15 = arith.constant dense<0.000000e+00> : vector<16x128xf32>
    %40 = vector.multi_reduction <add>, %38, %cst_15 [0] : vector<8x16x128xf32> to vector<16x128xf32>
    %41 = arith.addf %39, %40 : vector<16x128xf32>
    %c0_16 = arith.constant 0 : index
    %c0_17 = arith.constant 0 : index
    %42 = vector.load %arg6[%c0_16, %c0_17] : memref<16x128xf32, #tpu.memory_space<vmem>>, vector<16x128xf32>
    tpu.vector_store %arg6[%c0_16, %c0_17], %41 {strides = array<i32>} : memref<16x128xf32, #tpu.memory_space<vmem>>, vector<16x128xf32>,
    %c0_i32_18 = arith.constant 0 : i32
    %43 = arith.cmpi eq, %arg0, %c0_i32_18 : i32
    %44 = arith.extui %43 : i1 to i32
    %c0_i32_19 = arith.constant 0 : i32
    %45 = arith.cmpi ne, %44, %c0_i32_19 : i32
    scf.if %45 {
      %c0_20 = arith.constant 0 : index
      %c0_21 = arith.constant 0 : index
      %46 = vector.load %arg6[%c0_20, %c0_21] : memref<16x128xf32, #tpu.memory_space<vmem>>, vector<16x128xf32>
      %47 = vector.shape_cast %46 : vector<16x128xf32> to vector<1x16x128xf32>
      %cst_22 = arith.constant dense<0.000000e+00> : vector<1xf32>
      %48 = vector.multi_reduction <add>, %47, %cst_22 [1, 2] : vector<1x16x128xf32> to vector<1xf32>
      %49 = vector.shape_cast %48 : vector<1xf32> to vector<1x1x1xf32>
      %50 = vector.extract %49[0, 0, 0] : f32 from vector<1x1x1xf32>
      %51 = vector.broadcast %50 : f32 to vector<1x1xf32>
      %cst_23 = arith.constant 8.68055562E-4 : f32
      %52 = vector.broadcast %cst_23 : f32 to vector<1x1xf32>
      %53 = arith.mulf %51, %52 : vector<1x1xf32>
      %c0_24 = arith.constant 0 : index
      %c0_25 = arith.constant 0 : index
      %54 = vector.load %arg5[%c0_24, %c0_25] : memref<1x1xf32, #tpu.memory_space<vmem>>, vector<1x1xf32>
      tpu.vector_store %arg5[%c0_24, %c0_25], %53 {strides = array<i32>} : memref<1x1xf32, #tpu.memory_space<vmem>>, vector<1x1xf32>,
    } else {
    }
    return
  }
  func.func @transform_0(%arg0: i32) -> (i32, i32, i32) {
    %c0_i32 = arith.constant 0 : i32
    %c0_i32_0 = arith.constant 0 : i32
    %c0_i32_1 = arith.constant 0 : i32
    return %arg0, %c0_i32, %c0_i32_0 : i32, i32, i32
  }
  func.func @transform_1(%arg0: i32) -> (i32, i32, i32) {
    %c0_i32 = arith.constant 0 : i32
    %c0_i32_0 = arith.constant 0 : i32
    %c0_i32_1 = arith.constant 0 : i32
    return %arg0, %c0_i32, %c0_i32_0 : i32, i32, i32
  }
  func.func @transform_2(%arg0: i32) -> (i32, i32) {
    %c0_i32 = arith.constant 0 : i32
    %c0_i32_0 = arith.constant 0 : i32
    %c0_i32_1 = arith.constant 0 : i32
    return %c0_i32, %c0_i32_0 : i32, i32
  }
  func.func @transform_3(%arg0: i32) -> (i32, i32) {
    %c0_i32 = arith.constant 0 : i32
    %c0_i32_0 = arith.constant 0 : i32
    %c0_i32_1 = arith.constant 0 : i32
    return %c0_i32, %c0_i32_0 : i32, i32
  }
  func.func @transform_4(%arg0: i32) -> (i32, i32) {
    %c0_i32 = arith.constant 0 : i32
    %c0_i32_0 = arith.constant 0 : i32
    %c0_i32_1 = arith.constant 0 : i32
    return %c0_i32, %c0_i32_0 : i32, i32
  }
}

</mosaic_0001>

<bundles_post_ra>
// kernel: tpu_custom_call.1
= control target key start
LH: loop header
LB: loop body
LE: loop exit
PB: predicated region body
PF: predicated region fallthrough
CT: control target
= control target key end

     0   :  { %9 = vsyncpa [#allocation4], 0  ;;  %s3471_s0 = inlined_call_operand.hbm [shape: f32[8,16,16], index: 0, kind: input, shape index: {}]   ;;  %s3472_s1 = inlined_call_operand.hbm [shape: f32[8,16,16], index: 1, kind: input, shape index: {}]   ;;  %s3473_s2 = inlined_call_operand.vmem [shape: f32[16,256], index: 2, kind: input, shape index: {}]   ;;  %s3474_s3 = inlined_call_operand.vmem [shape: f32[32,16], index: 3, kind: input, shape index: {}]   ;;  %s3475_s4 = inlined_call_operand.hbm [shape: f32[1,1], index: 4, kind: output, shape index: {}]  }
   0x1   :  { %10 = vsyncpa [#allocation7], 0 }
   0x2   :  { %11 = vsyncpa [#allocation5], 0  ;;  %s2730_s15 = smov [#allocation3]   ;;  %s2658_s19 = scalar_lea.hbm %s3471_s0, 2048 }
   0x3   :  { %s17_s16 = sshll.u32 %s2730_s15, 4  ;;  %p2659_p0 = scmp.ne.s32.totalorder %s3471_s0, %s2658_s19  ;;  %s18_s16 = int_to_ptr.vmem [resolvable:$true] %s17_s16 }
   0x4   :  { %p2662_p1 = scmp.lt.u32.totalorder %s2658_s19, %s3471_s0 }
   0x6   :  { %p2664_p2 = pnand %p2662_p1, %p2659_p0 }
   0x8   :  { %2667 = shalt.err (!%p2664_p2)
}
   0x9   :  { %s2668_s24 = scalar_lea.vmem %s18_s16, 2048  ;;  %p2673_p4 = scmp.lt.s32.totalorder %s18_s16, %s18_s16 }
   0xa   :  { %p2669_p3 = scmp.ne.s32.totalorder %s18_s16, %s2668_s24  ;;  %p2674_p5 = scmp.lt.s32.totalorder %s2668_s24, %s2668_s24 }
   0xc   :  { %p2675_p6 = por %p2674_p5, %p2673_p4 }
   0xe   :  { %p2676_p7 = pnand %p2675_p6, %p2669_p3 }
  0x10   :  { %2679 = shalt.err (!%p2676_p7)
}
  0x11   :  { %s2731_s25 = smov 128   ;;  %s2732_s26 = smov 8  }
  0x12   :  { %23 = dma.hbm_to_vmem [thread:$0]  %s3471_s0, 2048, %s18_s16, [#allocation4], %s2731_s25, %s2731_s25, %s2732_s26  }
  0x13   :  { %s2733_s29 = smov [#allocation6]   ;;  %s2680_s7 = scalar_lea.hbm %s3472_s1, 2048 }
  0x14   :  { %s29_s30 = sshll.u32 %s2733_s29, 4  ;;  %p2681_p8 = scmp.ne.s32.totalorder %s3472_s1, %s2680_s7  ;;  %s30_s30 = int_to_ptr.vmem [resolvable:$true] %s29_s30 }
  0x15   :  { %p2684_p9 = scmp.lt.u32.totalorder %s2680_s7, %s3472_s1 }
  0x17   :  { %p2686_p10 = pnand %p2684_p9, %p2681_p8 }
  0x19   :  { %2689 = shalt.err (!%p2686_p10)
}
  0x1a   :  { %s2690_s12 = scalar_lea.vmem %s30_s30, 2048  ;;  %p2695_p12 = scmp.lt.s32.totalorder %s30_s30, %s30_s30 }
  0x1b   :  { %p2691_p11 = scmp.ne.s32.totalorder %s30_s30, %s2690_s12  ;;  %p2696_p13 = scmp.lt.s32.totalorder %s2690_s12, %s2690_s12 }
  0x1d   :  { %p2697_p0 = por %p2696_p13, %p2695_p12 }
  0x1f   :  { %p2698_p1 = pnand %p2697_p0, %p2691_p11 }
  0x21   :  { %2701 = shalt.err (!%p2698_p1)
}
  0x22   :  { %35 = dma.hbm_to_vmem [thread:$0]  %s3472_s1, 2048, %s30_s30, [#allocation7], %s2731_s25, %s2731_s25, %s2732_s26  }
  0x23   :  { %2724 = dma.done.wait [#allocation4], 2048  }
  0x24   :  { %2725 = vsyncadd [#allocation4], 4294965248 }
  0x25   :  { %2726 = dma.done.wait [#allocation7], 2048  }
  0x26   :  { %2727 = vsyncadd [#allocation7], 4294965248  ;;  %v2734_v0 = vmov 0.0   ;;  %v53_v1 = vld [vmem:[%s3473_s2 + $0x8] sm:$0xff]  ;;  %v55_v2 = vld [vmem:[%s3473_s2 + $0x18] sm:$0xff]  ;;  %vm76_vm0 = vcmask 130048  }
  0x27   :  { %189 = vmatprep.mubr.f32.mxu0 %v2734_v0  ;;  %362 = vmatprep.mubr.f32.mxu1 %v2734_v0  ;;  %v52_v3 = vld [vmem:[%s3473_s2] sm:$0xff]  ;;  %v2796_v4 = vpack.c.bf16 %v55_v2, %v53_v1  ;;  %v54_v5 = vld [vmem:[%s3473_s2 + $0x10] sm:$0xff]  ;;  %v61_v8 = vld [vmem:[#allocation3 + $0x8] sm:$0xff] }
  0x28   :  { %v2801_v6 = vpack.c.bf16 %v54_v5, %v52_v3  ;;  %v60_v7 = vld [vmem:[#allocation3] sm:$0xff]  ;;  %v62_v9 = vld [vmem:[#allocation3 + $0x10] sm:$0xff]  ;;  %v63_v10 = vld [vmem:[#allocation3 + $0x18] sm:$0xff] }
  0x29   :  { %2515 = vmatprep.subr.bf16.mxu0 %v2796_v4  ;;  %v64_v11 = vld [vmem:[#allocation3 + $0x20] sm:$0xff]  ;;  %v65_v12 = vld [vmem:[#allocation3 + $0x28] sm:$0xff]  ;;  %v66_v13 = vld [vmem:[#allocation3 + $0x30] sm:$0xff] }
  0x2a   :  { %2517 = vmatpush1.bf16.msra.mxu0 %v2801_v6  ;;  %v67_v14 = vld [vmem:[#allocation3 + $0x38] sm:$0xff]  ;;  %v68_v15 = vld [vmem:[#allocation3 + $0x40] sm:$0xff]  ;;  %v69_v16 = vld [vmem:[#allocation3 + $0x48] sm:$0xff] }
  0x2b   :  { %v70_v17 = vld [vmem:[#allocation3 + $0x50] sm:$0xff]  ;;  %v71_v18 = vld [vmem:[#allocation3 + $0x58] sm:$0xff]  ;;  %v72_v19 = vld [vmem:[#allocation3 + $0x60] sm:$0xff] }
  0x2c   :  { %v73_v20 = vld [vmem:[#allocation3 + $0x68] sm:$0xff]  ;;  %v74_v21 = vld [vmem:[#allocation3 + $0x70] sm:$0xff]  ;;  %v75_v22 = vld [vmem:[#allocation3 + $0x78] sm:$0xff] }
  0x2d   :  { %2418 = vmatmul.mubr.msk.f32.vlgmr.msra.gmra.mrb[0].mxu0 %vm76_vm0, %v60_v7  ;;  %v2840_v31 = vld [vmem:[%s3474_s3] sm:$0xff]  ;;  %v2848_v35 = vld [vmem:[%s3474_s3 + $0x8] sm:$0xff]  ;;  %v2856_v39 = vld [vmem:[%s3474_s3 + $0x10] sm:$0xff] }
  0x2e   :  { %195 = vmatprep.mubr.f32.mxu0 %v2734_v0  ;;  %v2864_v43 = vld [vmem:[%s3474_s3 + $0x18] sm:$0xff]  ;;  %s2735_s3 = smov [#allocation8]  }
  0x2f   :  { %s2408_s28 = sshll.u32 %s2735_s3, 4  ;;  %s2409_s28 = int_to_ptr.vmem [resolvable:$true] %s2408_s28 }
  0x30   :  { %s2702_s30 = scalar_lea.vmem %s2409_s28, 16  ;;  %s2706_s5 = scalar_lea.vmem %s2409_s28, 32 }
  0x31   :  { %2419 = vmatmul.mubr.msk.f32.gmra.mrb[2].mxu0 %vm76_vm0, %v61_v8  ;;  %v1204_v8 = vld [vmem:[#allocation6 + $0x10] sm:$0xff]  ;;  %p2703_p2 = scmp.ne.s32.totalorder %s2409_s28, %s2702_s30  ;;  %p2707_p3 = scmp.lt.s32.totalorder %s2409_s28, %s2409_s28 }
  0x32   :  { %201 = vmatprep.mubr.f32.mxu0 %v2734_v0  ;;  %p2708_p4 = scmp.lt.s32.totalorder %s2706_s5, %s2702_s30 }
  0x34   :  { %p2709_p5 = por %p2708_p4, %p2707_p3 }
  0x35   :  { %2420 = vmatmul.mubr.msk.f32.gmra.mrb[4].mxu0 %vm76_vm0, %v62_v9  ;;  %v1205_v9 = vld [vmem:[#allocation6 + $0x18] sm:$0xff] }
  0x36   :  { %207 = vmatprep.mubr.f32.mxu0 %v2734_v0  ;;  %p2710_p6 = pnand %p2709_p5, %p2703_p2 }
  0x39   :  { %2421 = vmatmul.mubr.msk.f32.gmra.mrb[6].mxu0 %vm76_vm0, %v63_v10  ;;  %v1206_v10 = vld [vmem:[#allocation6 + $0x20] sm:$0xff] }
  0x3a   :  { %213 = vmatprep.mubr.f32.mxu0 %v2734_v0 }
  0x3d   :  { %2422 = vmatmul.mubr.msk.f32.gmra.mrb[8].mxu0 %vm76_vm0, %v64_v11  ;;  %v1207_v11 = vld [vmem:[#allocation6 + $0x28] sm:$0xff] }
  0x3e   :  { %219 = vmatprep.mubr.f32.mxu0 %v2734_v0 }
  0x41   :  { %2423 = vmatmul.mubr.msk.f32.gmra.mrb[10].mxu0 %vm76_vm0, %v65_v12  ;;  %v1208_v12 = vld [vmem:[#allocation6 + $0x30] sm:$0xff] }
  0x42   :  { %225 = vmatprep.mubr.f32.mxu0 %v2734_v0 }
  0x45   :  { %2424 = vmatmul.mubr.msk.f32.gmra.mrb[12].mxu0 %vm76_vm0, %v66_v13  ;;  %v1209_v13 = vld [vmem:[#allocation6 + $0x38] sm:$0xff] }
  0x46   :  { %231 = vmatprep.mubr.f32.mxu0 %v2734_v0 }
  0x49   :  { %2425 = vmatmul.mubr.msk.f32.gmra.mrb[14].mxu0 %vm76_vm0, %v67_v14  ;;  %v1210_v14 = vld [vmem:[#allocation6 + $0x40] sm:$0xff] }
  0x4a   :  { %237 = vmatprep.mubr.f32.mxu0 %v2734_v0 }
  0x4d   :  { %2426 = vmatmul.mubr.msk.f32.gmra.mrb[16].mxu0 %vm76_vm0, %v68_v15  ;;  %v1211_v15 = vld [vmem:[#allocation6 + $0x48] sm:$0xff] }
  0x4e   :  { %243 = vmatprep.mubr.f32.mxu0 %v2734_v0 }
  0x51   :  { %2427 = vmatmul.mubr.msk.f32.gmra.mrb[18].mxu0 %vm76_vm0, %v69_v16  ;;  %v1212_v16 = vld [vmem:[#allocation6 + $0x50] sm:$0xff] }
  0x52   :  { %249 = vmatprep.mubr.f32.mxu0 %v2734_v0 }
  0x55   :  { %2428 = vmatmul.mubr.msk.f32.gmra.mrb[20].mxu0 %vm76_vm0, %v70_v17 }
  0x56   :  { %255 = vmatprep.mubr.f32.mxu0 %v2734_v0 }
  0x59   :  { %2429 = vmatmul.mubr.msk.f32.gmra.mrb[22].mxu0 %vm76_vm0, %v71_v18 }
  0x5a   :  { %261 = vmatprep.mubr.f32.mxu0 %v2734_v0 }
  0x5d   :  { %2430 = vmatmul.mubr.msk.f32.gmra.mrb[24].mxu0 %vm76_vm0, %v72_v19  ;;  %v1213_v19 = vld [vmem:[#allocation6 + $0x58] sm:$0xff] }
  0x5e   :  { %267 = vmatprep.mubr.f32.mxu0 %v2734_v0 }
  0x61   :  { %2431 = vmatmul.mubr.msk.f32.gmra.mrb[26].mxu0 %vm76_vm0, %v73_v20 }
  0x62   :  { %273 = vmatprep.mubr.f32.mxu0 %v2734_v0 }
  0x65   :  { %2432 = vmatmul.mubr.msk.f32.gmra.mrb[28].mxu0 %vm76_vm0, %v74_v21 }
  0x66   :  { %279 = vmatprep.mubr.f32.mxu0 %v2734_v0 }
  0x69   :  { %2433 = vmatmul.mubr.msk.f32.gmra.mrb[30].mxu0 %vm76_vm0, %v75_v22 }
  0x6a   :  { %718 = vmatprep.mubr.f32.mxu0 %v2734_v0 }
 0x100   :  { %v191_v23 = vpop.f32.mrb[0].mxu0 }
 0x101   :  { %v193_v24 = vpop.f32.mrb[1].mxu0 }
 0x104   :  { %v197_v25 = vpop.f32.mrb[2].mxu0 }
 0x105   :  { %v2520_v26 = vpack.c.bf16 %v197_v25, %v191_v23  ;;  %v199_v27 = vpop.f32.mrb[3].mxu0  ;;  %v1215_v25 = vld [vmem:[#allocation6 + $0x68] sm:$0xff] }
 0x106   :  { %v2518_v28 = vpack.c.bf16 %v199_v27, %v193_v24  ;;  %v1214_v24 = vld [vmem:[#allocation6 + $0x60] sm:$0xff]  ;;  %v1217_v27 = vld [vmem:[#allocation6 + $0x78] sm:$0xff] }
 0x108   :  { %v203_v29 = vpop.f32.mrb[4].mxu0  ;;  %2519 = vmatprep.subr.bf16.mxu1 %v2518_v28 }
 0x109   :  { %v205_v30 = vpop.f32.mrb[5].mxu0  ;;  %2521 = vmatpush1.bf16.msra.mxu1 %v2520_v26  ;;  %v1216_v26 = vld [vmem:[#allocation6 + $0x70] sm:$0xff] }
 0x10c   :  { %v209_v32 = vpop.f32.mrb[6].mxu0  ;;  %2434 = vmatmul.mubr.msk.f32.vlgmr.msra.gmra.mrb[0].mxu1 %vm76_vm0, %v2840_v31 }
 0x10d   :  { %v2524_v33 = vpack.c.bf16 %v209_v32, %v203_v29  ;;  %v211_v34 = vpop.f32.mrb[7].mxu0  ;;  %368 = vmatprep.mubr.f32.mxu1 %v2734_v0 }
 0x10e   :  { %v2522_v36 = vpack.c.bf16 %v211_v34, %v205_v30 }
 0x110   :  { %v215_v37 = vpop.f32.mrb[8].mxu0  ;;  %2435 = vmatmul.mubr.msk.f32.gmra.mrb[2].mxu1 %vm76_vm0, %v2848_v35  ;;  %2523 = vmatprep.subr.bf16.mxu1 %v2522_v36 }
 0x111   :  { %v217_v38 = vpop.f32.mrb[9].mxu0  ;;  %2525 = vmatpush1.bf16.msra.mxu1 %v2524_v33  ;;  %374 = vmatprep.mubr.f32.mxu1 %v2734_v0 }
 0x114   :  { %v221_v40 = vpop.f32.mrb[10].mxu0  ;;  %2436 = vmatmul.mubr.msk.f32.gmra.mrb[4].mxu1 %vm76_vm0, %v2856_v39 }
 0x115   :  { %v2528_v41 = vpack.c.bf16 %v221_v40, %v215_v37  ;;  %v223_v42 = vpop.f32.mrb[11].mxu0  ;;  %380 = vmatprep.mubr.f32.mxu1 %v2734_v0 }
 0x116   :  { %v2526_v44 = vpack.c.bf16 %v223_v42, %v217_v38 }
 0x118   :  { %v227_v45 = vpop.f32.mrb[12].mxu0  ;;  %2437 = vmatmul.mubr.msk.f32.gmra.mrb[6].mxu1 %vm76_vm0, %v2864_v43  ;;  %2527 = vmatprep.subr.bf16.mxu1 %v2526_v44 }
 0x119   :  { %v229_v46 = vpop.f32.mrb[13].mxu0  ;;  %451 = vmatprep.mubr.f32.mxu1 %v2734_v0 }
 0x11c   :  { %v233_v47 = vpop.f32.mrb[14].mxu0  ;;  %2438 = vmatmul.mubr.msk.f32.vlgmr.msra.gmra.mrb[8].mxu1 %vm76_vm0, %v2840_v31 }
 0x11d   :  { %v2532_v48 = vpack.c.bf16 %v233_v47, %v227_v45  ;;  %2529 = vmatpush1.bf16.msra.mxu1 %v2528_v41  ;;  %v235_v49 = vpop.f32.mrb[15].mxu0  ;;  %457 = vmatprep.mubr.f32.mxu1 %v2734_v0 }
 0x11e   :  { %v2530_v50 = vpack.c.bf16 %v235_v49, %v229_v46 }
 0x120   :  { %v239_v51 = vpop.f32.mrb[16].mxu0  ;;  %2439 = vmatmul.mubr.msk.f32.gmra.mrb[10].mxu1 %vm76_vm0, %v2848_v35  ;;  %2531 = vmatprep.subr.bf16.mxu1 %v2530_v50 }
 0x121   :  { %v241_v52 = vpop.f32.mrb[17].mxu0  ;;  %463 = vmatprep.mubr.f32.mxu1 %v2734_v0 }
 0x124   :  { %v245_v53 = vpop.f32.mrb[18].mxu0  ;;  %2440 = vmatmul.mubr.msk.f32.gmra.mrb[12].mxu1 %vm76_vm0, %v2856_v39 }
 0x125   :  { %v2536_v54 = vpack.c.bf16 %v245_v53, %v239_v51  ;;  %v247_v55 = vpop.f32.mrb[19].mxu0  ;;  %469 = vmatprep.mubr.f32.mxu1 %v2734_v0 }
 0x126   :  { %v2534_v56 = vpack.c.bf16 %v247_v55, %v241_v52 }
 0x128   :  { %2441 = vmatmul.mubr.msk.f32.gmra.mrb[14].mxu1 %vm76_vm0, %v2864_v43  ;;  %2535 = vmatprep.subr.bf16.mxu0 %v2534_v56  ;;  %v251_v57 = vpop.f32.mrb[20].mxu0 }
 0x129   :  { %2537 = vmatpush1.bf16.msra.mxu0 %v2536_v54  ;;  %540 = vmatprep.mubr.f32.mxu1 %v2734_v0  ;;  %v253_v58 = vpop.f32.mrb[21].mxu0 }
 0x12c   :  { %2442 = vmatmul.mubr.msk.f32.vlgmr.msra.gmra.mrb[16].mxu1 %vm76_vm0, %v2840_v31  ;;  %2450 = vmatmul.mubr.msk.f32.vlgmr.msra.gmra.mrb[32].mxu0 %vm76_vm0, %v2840_v31  ;;  %v257_v59 = vpop.f32.mrb[22].mxu0 }
 0x12d   :  { %2533 = vmatpush1.bf16.msra.mxu1 %v2532_v48  ;;  %724 = vmatprep.mubr.f32.mxu0 %v2734_v0  ;;  %v2540_v60 = vpack.c.bf16 %v257_v59, %v251_v57  ;;  %v259_v61 = vpop.f32.mrb[23].mxu0 }
 0x12e   :  { %v2538_v62 = vpack.c.bf16 %v259_v61, %v253_v58  ;;  %546 = vmatprep.mubr.f32.mxu1 %v2734_v0 }
 0x130   :  { %2451 = vmatmul.mubr.msk.f32.gmra.mrb[34].mxu0 %vm76_vm0, %v2848_v35  ;;  %v263_v63 = vpop.f32.mrb[24].mxu0  ;;  %2443 = vmatmul.mubr.msk.f32.gmra.mrb[18].mxu1 %vm76_vm0, %v2848_v35 }
 0x131   :  { %v265_v1 = vpop.f32.mrb[25].mxu0  ;;  %730 = vmatprep.mubr.f32.mxu0 %v2734_v0  ;;  %552 = vmatprep.mubr.f32.mxu1 %v2734_v0 }
 0x132   :  { %2539 = vmatprep.subr.bf16.mxu1 %v2538_v62 }
 0x134   :  { %v269_v2 = vpop.f32.mrb[26].mxu0  ;;  %2452 = vmatmul.mubr.msk.f32.gmra.mrb[36].mxu0 %vm76_vm0, %v2856_v39  ;;  %2444 = vmatmul.mubr.msk.f32.gmra.mrb[20].mxu1 %vm76_vm0, %v2856_v39 }
 0x135   :  { %v2544_v3 = vpack.c.bf16 %v269_v2, %v263_v63  ;;  %v271_v5 = vpop.f32.mrb[27].mxu0  ;;  %736 = vmatprep.mubr.f32.mxu0 %v2734_v0  ;;  %558 = vmatprep.mubr.f32.mxu1 %v2734_v0 }
 0x136   :  { %v2542_v7 = vpack.c.bf16 %v271_v5, %v265_v1 }
 0x138   :  { %2453 = vmatmul.mubr.msk.f32.gmra.mrb[38].mxu0 %vm76_vm0, %v2864_v43  ;;  %2543 = vmatprep.subr.bf16.mxu0 %v2542_v7  ;;  %v275_v17 = vpop.f32.mrb[28].mxu0 }
 0x139   :  { %2545 = vmatpush1.bf16.msra.mxu0 %v2544_v3  ;;  %896 = vmatprep.mubr.f32.mxu0 %v2734_v0  ;;  %v277_v18 = vpop.f32.mrb[29].mxu0 }
 0x13a   :  { %2445 = vmatmul.mubr.msk.f32.gmra.mrb[22].mxu1 %vm76_vm0, %v2864_v43  ;;  %2551 = vmatprep.subr.bf16.mxu0 %v2796_v4  ;;  %v1202_v4 = vld [vmem:[#allocation6] sm:$0xff] }
 0x13b   :  { %629 = vmatprep.mubr.f32.mxu1 %v2734_v0 }
 0x13c   :  { %2458 = vmatmul.mubr.msk.f32.vlgmr.msra.gmra.mrb[40].mxu0 %vm76_vm0, %v2840_v31  ;;  %v281_v20 = vpop.f32.mrb[30].mxu0 }
 0x13d   :  { %902 = vmatprep.mubr.f32.mxu0 %v2734_v0  ;;  %2553 = vmatpush1.bf16.msra.mxu0 %v2801_v6  ;;  %v1203_v6 = vld [vmem:[#allocation6 + $0x8] sm:$0xff]  ;;  %v2548_v21 = vpack.c.bf16 %v281_v20, %v275_v17  ;;  %v283_v22 = vpop.f32.mrb[31].mxu0 }
 0x13e   :  { %2446 = vmatmul.mubr.msk.f32.vlgmr.msra.gmra.mrb[24].mxu1 %vm76_vm0, %v2840_v31  ;;  %v2546_v23 = vpack.c.bf16 %v283_v22, %v277_v18 }
 0x13f   :  { %2541 = vmatpush1.bf16.msra.mxu1 %v2540_v60  ;;  %635 = vmatprep.mubr.f32.mxu1 %v2734_v0 }
 0x140   :  { %2459 = vmatmul.mubr.msk.f32.gmra.mrb[42].mxu0 %vm76_vm0, %v2848_v35  ;;  %2547 = vmatprep.subr.bf16.mxu1 %v2546_v23 }
 0x141   :  { %908 = vmatprep.mubr.f32.mxu0 %v2734_v0 }
 0x142   :  { %2447 = vmatmul.mubr.msk.f32.gmra.mrb[26].mxu1 %vm76_vm0, %v2848_v35 }
 0x143   :  { %641 = vmatprep.mubr.f32.mxu1 %v2734_v0 }
 0x144   :  { %2460 = vmatmul.mubr.msk.f32.gmra.mrb[44].mxu0 %vm76_vm0, %v2856_v39 }
 0x145   :  { %914 = vmatprep.mubr.f32.mxu0 %v2734_v0 }
 0x146   :  { %2448 = vmatmul.mubr.msk.f32.gmra.mrb[28].mxu1 %vm76_vm0, %v2856_v39 }
 0x147   :  { %647 = vmatprep.mubr.f32.mxu1 %v2734_v0 }
 0x148   :  { %2461 = vmatmul.mubr.msk.f32.gmra.mrb[46].mxu0 %vm76_vm0, %v2864_v43 }
 0x149   :  { %1330 = vmatprep.mubr.f32.mxu0 %v2734_v0 }
 0x14a   :  { %2449 = vmatmul.mubr.msk.f32.gmra.mrb[30].mxu1 %vm76_vm0, %v2864_v43 }
 0x14b   :  { %807 = vmatprep.mubr.f32.mxu1 %v2734_v0 }
 0x14c   :  { %2466 = vmatmul.mubr.msk.f32.vlgmr.msra.gmra.mrb[48].mxu0 %vm76_vm0, %v1202_v4 }
 0x14d   :  { %1336 = vmatprep.mubr.f32.mxu0 %v2734_v0 }
 0x14e   :  { %2454 = vmatmul.mubr.msk.f32.vlgmr.msra.gmra.mrb[32].mxu1 %vm76_vm0, %v2840_v31 }
 0x14f   :  { %813 = vmatprep.mubr.f32.mxu1 %v2734_v0  ;;  %2549 = vmatpush1.bf16.msra.mxu1 %v2548_v21 }
 0x150   :  { %2467 = vmatmul.mubr.msk.f32.gmra.mrb[50].mxu0 %vm76_vm0, %v1203_v6 }
 0x151   :  { %1342 = vmatprep.mubr.f32.mxu0 %v2734_v0 }
 0x152   :  { %2455 = vmatmul.mubr.msk.f32.gmra.mrb[34].mxu1 %vm76_vm0, %v2848_v35 }
 0x153   :  { %819 = vmatprep.mubr.f32.mxu1 %v2734_v0 }
 0x154   :  { %2468 = vmatmul.mubr.msk.f32.gmra.mrb[52].mxu0 %vm76_vm0, %v1204_v8 }
 0x155   :  { %1348 = vmatprep.mubr.f32.mxu0 %v2734_v0 }
 0x156   :  { %2456 = vmatmul.mubr.msk.f32.gmra.mrb[36].mxu1 %vm76_vm0, %v2856_v39 }
 0x157   :  { %825 = vmatprep.mubr.f32.mxu1 %v2734_v0 }
 0x158   :  { %2469 = vmatmul.mubr.msk.f32.gmra.mrb[54].mxu0 %vm76_vm0, %v1205_v9 }
 0x159   :  { %1354 = vmatprep.mubr.f32.mxu0 %v2734_v0 }
 0x15a   :  { %2457 = vmatmul.mubr.msk.f32.gmra.mrb[38].mxu1 %vm76_vm0, %v2864_v43 }
 0x15b   :  { %985 = vmatprep.mubr.f32.mxu1 %v2734_v0 }
 0x15c   :  { %2470 = vmatmul.mubr.msk.f32.gmra.mrb[56].mxu0 %vm76_vm0, %v1206_v10 }
 0x15d   :  { %1360 = vmatprep.mubr.f32.mxu0 %v2734_v0 }
 0x15e   :  { %2462 = vmatmul.mubr.msk.f32.vlgmr.msra.gmra.mrb[40].mxu1 %vm76_vm0, %v2840_v31 }
 0x15f   :  { %991 = vmatprep.mubr.f32.mxu1 %v2734_v0 }
 0x160   :  { %2471 = vmatmul.mubr.msk.f32.gmra.mrb[58].mxu0 %vm76_vm0, %v1207_v11 }
 0x161   :  { %1366 = vmatprep.mubr.f32.mxu0 %v2734_v0 }
 0x162   :  { %2463 = vmatmul.mubr.msk.f32.gmra.mrb[42].mxu1 %vm76_vm0, %v2848_v35 }
 0x163   :  { %997 = vmatprep.mubr.f32.mxu1 %v2734_v0 }
 0x164   :  { %2472 = vmatmul.mubr.msk.f32.gmra.mrb[60].mxu0 %vm76_vm0, %v1208_v12 }
 0x165   :  { %1372 = vmatprep.mubr.f32.mxu0 %v2734_v0 }
 0x166   :  { %2464 = vmatmul.mubr.msk.f32.gmra.mrb[44].mxu1 %vm76_vm0, %v2856_v39 }
 0x167   :  { %1003 = vmatprep.mubr.f32.mxu1 %v2734_v0 }
 0x168   :  { %2473 = vmatmul.mubr.msk.f32.gmra.mrb[62].mxu0 %vm76_vm0, %v1209_v13 }
 0x169   :  { %1378 = vmatprep.mubr.f32.mxu0 %v2734_v0 }
 0x16a   :  { %2465 = vmatmul.mubr.msk.f32.gmra.mrb[46].mxu1 %vm76_vm0, %v2864_v43 }
 0x16b   :  { %1491 = vmatprep.mubr.f32.mxu1 %v2734_v0 }
 0x16c   :  { %2474 = vmatmul.mubr.msk.f32.gmra.mrb[64].mxu0 %vm76_vm0, %v1210_v14 }
 0x16d   :  { %1384 = vmatprep.mubr.f32.mxu0 %v2734_v0 }
 0x170   :  { %2475 = vmatmul.mubr.msk.f32.gmra.mrb[66].mxu0 %vm76_vm0, %v1211_v15 }
 0x171   :  { %1390 = vmatprep.mubr.f32.mxu0 %v2734_v0 }
 0x174   :  { %2476 = vmatmul.mubr.msk.f32.gmra.mrb[68].mxu0 %vm76_vm0, %v1212_v16 }
 0x175   :  { %1396 = vmatprep.mubr.f32.mxu0 %v2734_v0 }
 0x178   :  { %2477 = vmatmul.mubr.msk.f32.gmra.mrb[70].mxu0 %vm76_vm0, %v1213_v19 }
 0x179   :  { %1402 = vmatprep.mubr.f32.mxu0 %v2734_v0 }
 0x17c   :  { %2478 = vmatmul.mubr.msk.f32.gmra.mrb[72].mxu0 %vm76_vm0, %v1214_v24 }
 0x17d   :  { %1408 = vmatprep.mubr.f32.mxu0 %v2734_v0 }
 0x180   :  { %2479 = vmatmul.mubr.msk.f32.gmra.mrb[74].mxu0 %vm76_vm0, %v1215_v25 }
 0x181   :  { %1414 = vmatprep.mubr.f32.mxu0 %v2734_v0 }
 0x184   :  { %2480 = vmatmul.mubr.msk.f32.gmra.mrb[76].mxu0 %vm76_vm0, %v1216_v26 }
 0x185   :  { %1420 = vmatprep.mubr.f32.mxu0 %v2734_v0 }
 0x188   :  { %2481 = vmatmul.mubr.msk.f32.gmra.mrb[78].mxu0 %vm76_vm0, %v1217_v27 }
 0x189   :  { %1847 = vmatprep.mubr.f32.mxu0 %v2734_v0 }
 0x1df   :  { %v364_v34 = vpop.f32.mrb[0].mxu1 }
 0x1e0   :  { %v366_v38 = vpop.f32.mrb[1].mxu1 }
 0x1e3   :  { %v370_v41 = vpop.f32.mrb[2].mxu1 }
 0x1e4   :  { %v372_v44 = vpop.f32.mrb[3].mxu1 }
 0x1e7   :  { %v376_v47 = vpop.f32.mrb[4].mxu1 }
 0x1e8   :  { %v1026_v50 = vadd.f32 %v376_v47, %v366_v38  ;;  %v378_v51 = vpop.f32.mrb[5].mxu1 }
 0x1e9   :  { %v1010_v54 = vsub.f32 %v364_v34, %v378_v51 }
 0x1ea   :  { %v1058_v57 = vmul.f32 %v1026_v50, %v1026_v50 }
 0x1eb   :  { %v382_v55 = vpop.f32.mrb[6].mxu1  ;;  %v1042_v62 = vmul.f32 %v1010_v54, %v1010_v54 }
 0x1ec   :  { %v1027_v58 = vadd.f32 %v382_v55, %v372_v44  ;;  %v384_v59 = vpop.f32.mrb[7].mxu1 }
 0x1ed   :  { %v1011_v63 = vsub.f32 %v370_v41, %v384_v59  ;;  %v2991_v4 = vadd.f32 %v1058_v57, %v1042_v62 }
 0x1ee   :  { %v1059_v3 = vmul.f32 %v1027_v58, %v1027_v58 }
 0x1ef   :  { %v453_v1 = vpop.f32.mrb[8].mxu1  ;;  %v1043_v6 = vmul.f32 %v1011_v63, %v1011_v63  ;;  %2594 = vrsqrt.f32 %v2991_v4  ;;  %vm1092_vm1 = vcmp.eq.f32.partialorder %v2991_v4, inf  ;;  %vm1094_vm3 = vcmp.eq.f32.partialorder %v2991_v4, 0.0 }
 0x1f0   :  { %v455_v5 = vpop.f32.mrb[9].mxu1 }
 0x1f1   :  { %v2993_v11 = vadd.f32 %v1059_v3, %v1043_v6 }
 0x1f3   :  { %v459_v8 = vpop.f32.mrb[10].mxu1  ;;  %2596 = vrsqrt.f32 %v2993_v11  ;;  %vm1099_vm2 = vcmp.eq.f32.partialorder %v2993_v11, inf  ;;  %vm1101_vm6 = vcmp.eq.f32.partialorder %v2993_v11, 0.0 }
 0x1f4   :  { %v461_v9 = vpop.f32.mrb[11].mxu1 }
 0x1f7   :  { %v465_v12 = vpop.f32.mrb[12].mxu1 }
 0x1f8   :  { %v1028_v14 = vadd.f32 %v465_v12, %v455_v5  ;;  %v467_v15 = vpop.f32.mrb[13].mxu1 }
 0x1f9   :  { %v1012_v16 = vsub.f32 %v453_v1, %v467_v15 }
 0x1fa   :  { %v1060_v18 = vmul.f32 %v1028_v14, %v1028_v14 }
 0x1fb   :  { %v471_v17 = vpop.f32.mrb[14].mxu1  ;;  %v1044_v22 = vmul.f32 %v1012_v16, %v1012_v16 }
 0x1fc   :  { %v1029_v19 = vadd.f32 %v471_v17, %v461_v9  ;;  %v473_v20 = vpop.f32.mrb[15].mxu1 }
 0x1fd   :  { %v1013_v23 = vsub.f32 %v459_v8, %v473_v20 }
 0x1fe   :  { %v1061_v27 = vmul.f32 %v1029_v19, %v1029_v19 }
 0x1ff   :  { %v720_v28 = vpop.f32.mrb[32].mxu0  ;;  %v542_v24 = vpop.f32.mrb[16].mxu1 }
 0x200   :  { %v722_v29 = vpop.f32.mrb[33].mxu0 }
 0x203   :  { %v726_v30 = vpop.f32.mrb[34].mxu0 }
 0x204   :  { %v728_v32 = vpop.f32.mrb[35].mxu0 }
 0x207   :  { %v732_v33 = vpop.f32.mrb[36].mxu0 }
 0x208   :  { %v1034_v36 = vadd.f32 %v732_v33, %v722_v29  ;;  %v734_v37 = vpop.f32.mrb[37].mxu0 }
 0x209   :  { %v1018_v40 = vsub.f32 %v720_v28, %v734_v37  ;;  %v544_v28 = vpop.f32.mrb[17].mxu1 }
 0x20a   :  { %v1066_v42 = vmul.f32 %v1034_v36, %v1034_v36  ;;  %v548_v33 = vpop.f32.mrb[18].mxu1 }
 0x20b   :  { %v1050_v45 = vmul.f32 %v1018_v40, %v1018_v40  ;;  %v738_v46 = vpop.f32.mrb[38].mxu0  ;;  %v550_v36 = vpop.f32.mrb[19].mxu1 }
 0x20c   :  { %v1035_v48 = vadd.f32 %v738_v46, %v728_v32  ;;  %v740_v49 = vpop.f32.mrb[39].mxu0  ;;  %v1045_v32 = vmul.f32 %v1013_v23, %v1013_v23  ;;  %v554_v40 = vpop.f32.mrb[20].mxu1 }
 0x20d   :  { %v2987_v52 = vadd.f32 %v1066_v42, %v1050_v45  ;;  %v1019_v53 = vsub.f32 %v726_v30, %v740_v49  ;;  %v2995_v30 = vadd.f32 %v1060_v18, %v1044_v22  ;;  %v1030_v45 = vadd.f32 %v554_v40, %v544_v28  ;;  %v556_v46 = vpop.f32.mrb[21].mxu1 }
 0x20e   :  { %v1067_v56 = vmul.f32 %v1035_v48, %v1035_v48  ;;  %v2997_v44 = vadd.f32 %v1061_v27, %v1045_v32  ;;  %v1014_v49 = vsub.f32 %v542_v24, %v556_v46  ;;  %v560_v50 = vpop.f32.mrb[22].mxu1 }
 0x20f   :  { %v1051_v60 = vmul.f32 %v1019_v53, %v1019_v53  ;;  %v898_v61 = vpop.f32.mrb[40].mxu0  ;;  %v562_v53 = vpop.f32.mrb[23].mxu1  ;;  %2598 = vrsqrt.f32 %v2987_v52  ;;  %vm1148_vm9 = vcmp.eq.f32.partialorder %v2987_v52, inf  ;;  %vm1150_vm10 = vcmp.eq.f32.partialorder %v2987_v52, 0.0 }
 0x210   :  { %v900_v2 = vpop.f32.mrb[41].mxu0  ;;  %v1046_v59 = vmul.f32 %v1014_v49, %v1014_v49  ;;  %vm1106_vm12 = vcmp.eq.f32.partialorder %v2995_v30, inf  ;;  %vm1113_vm13 = vcmp.eq.f32.partialorder %v2997_v44, inf  ;;  %vm1108_vm14 = vcmp.eq.f32.partialorder %v2995_v30, 0.0 }
 0x211   :  { %v2989_v7 = vadd.f32 %v1067_v56, %v1051_v60  ;;  %v1062_v56 = vmul.f32 %v1030_v45, %v1030_v45  ;;  %v631_v57 = vpop.f32.mrb[24].mxu1  ;;  %v1031_v60 = vadd.f32 %v560_v50, %v550_v36  ;;  %vm1115_vm15 = vcmp.eq.f32.partialorder %v2997_v44, 0.0 }
 0x212   :  { %v633_v62 = vpop.f32.mrb[25].mxu1 }
 0x213   :  { %v904_v10 = vpop.f32.mrb[42].mxu0  ;;  %v1063_v3 = vmul.f32 %v1031_v60, %v1031_v60  ;;  %vm1155_vm11 = vcmp.eq.f32.partialorder %v2989_v7, inf }
 0x214   :  { %v906_v13 = vpop.f32.mrb[43].mxu0 }
 0x215   :  { %v637_v1 = vpop.f32.mrb[26].mxu1 }
 0x216   :  { %v639_v6 = vpop.f32.mrb[27].mxu1 }
 0x217   :  { %v910_v21 = vpop.f32.mrb[44].mxu0 }
 0x218   :  { %v1038_v25 = vadd.f32 %v910_v21, %v900_v2  ;;  %v912_v26 = vpop.f32.mrb[45].mxu0  ;;  %v3003_v2 = vadd.f32 %v1062_v56, %v1046_v59 }
 0x219   :  { %v1022_v29 = vsub.f32 %v898_v61, %v912_v26  ;;  %v1015_v61 = vsub.f32 %v548_v33, %v562_v53  ;;  %v643_v9 = vpop.f32.mrb[28].mxu1 }
 0x21a   :  { %v1070_v34 = vmul.f32 %v1038_v25, %v1038_v25  ;;  %v1032_v14 = vadd.f32 %v643_v9, %v633_v62  ;;  %v645_v15 = vpop.f32.mrb[29].mxu1 }
 0x21b   :  { %v1054_v37 = vmul.f32 %v1022_v29, %v1022_v29  ;;  %v916_v38 = vpop.f32.mrb[46].mxu0  ;;  %v1047_v5 = vmul.f32 %v1015_v61, %v1015_v61  ;;  %v1016_v17 = vsub.f32 %v631_v57, %v645_v15 }
 0x21c   :  { %v1039_v41 = vadd.f32 %v916_v38, %v906_v13  ;;  %v918_v42 = vpop.f32.mrb[47].mxu0  ;;  %v1064_v19 = vmul.f32 %v1032_v14, %v1032_v14 }
 0x21d   :  { %v2999_v47 = vadd.f32 %v1070_v34, %v1054_v37  ;;  %v1023_v48 = vsub.f32 %v904_v10, %v918_v42  ;;  %v3005_v13 = vadd.f32 %v1063_v3, %v1047_v5  ;;  %v649_v18 = vpop.f32.mrb[30].mxu1  ;;  %v1048_v23 = vmul.f32 %v1016_v17, %v1016_v17 }
 0x21e   :  { %v1071_v51 = vmul.f32 %v1039_v41, %v1039_v41  ;;  %v1033_v20 = vadd.f32 %v649_v18, %v639_v6  ;;  %v651_v21 = vpop.f32.mrb[31].mxu1 }
 0x21f   :  { %v1055_v54 = vmul.f32 %v1023_v48, %v1023_v48  ;;  %v1332_v55 = vpop.f32.mrb[48].mxu0  ;;  %v1017_v24 = vsub.f32 %v637_v1, %v651_v21  ;;  %v3007_v29 = vadd.f32 %v1064_v19, %v1048_v23 }
 0x220   :  { %v1334_v58 = vpop.f32.mrb[49].mxu0  ;;  %v1065_v27 = vmul.f32 %v1033_v20, %v1033_v20 }
 0x221   :  { %v3001_v63 = vadd.f32 %v1071_v51, %v1055_v54  ;;  %v809_v25 = vpop.f32.mrb[32].mxu1  ;;  %v1049_v32 = vmul.f32 %v1017_v24, %v1017_v24 }
 0x222   :  { %v811_v28 = vpop.f32.mrb[33].mxu1 }
 0x223   :  { %v1338_v8 = vpop.f32.mrb[50].mxu0  ;;  %v3011_v37 = vadd.f32 %v1065_v27, %v1049_v32 }
 0x224   :  { %v2556_v10 = vpack.c.bf16 %v1338_v8, %v1332_v55  ;;  %v1340_v12 = vpop.f32.mrb[51].mxu0 }
 0x225   :  { %v2554_v16 = vpack.c.bf16 %v1340_v12, %v1334_v58  ;;  %v815_v33 = vpop.f32.mrb[34].mxu1 }
 0x226   :  { %v817_v34 = vpop.f32.mrb[35].mxu1 }
 0x227   :  { %2555 = vmatprep.subr.bf16.mxu1 %v2554_v16  ;;  %v1344_v22 = vpop.f32.mrb[52].mxu0 }
 0x228   :  { %2557 = vmatpush1.bf16.msra.mxu1 %v2556_v10  ;;  %v1346_v26 = vpop.f32.mrb[53].mxu0 }
 0x229   :  { %v821_v38 = vpop.f32.mrb[36].mxu1 }
 0x22a   :  { %v1036_v42 = vadd.f32 %v821_v38, %v811_v28  ;;  %v823_v45 = vpop.f32.mrb[37].mxu1 }
 0x22b   :  { %2482 = vmatmul.mubr.msk.f32.vlgmr.msra.gmra.mrb[48].mxu1 %vm76_vm0, %v2840_v31  ;;  %v1350_v36 = vpop.f32.mrb[54].mxu0  ;;  %v1020_v48 = vsub.f32 %v809_v25, %v823_v45 }
 0x22c   :  { %1497 = vmatprep.mubr.f32.mxu1 %v2734_v0  ;;  %v2560_v40 = vpack.c.bf16 %v1350_v36, %v1344_v22  ;;  %v1352_v41 = vpop.f32.mrb[55].mxu0  ;;  %v1068_v50 = vmul.f32 %v1036_v42, %v1036_v42 }
 0x22d   :  { %v2558_v46 = vpack.c.bf16 %v1352_v41, %v1346_v26  ;;  %v827_v49 = vpop.f32.mrb[38].mxu1  ;;  %v1052_v55 = vmul.f32 %v1020_v48, %v1020_v48 }
 0x22e   :  { %v1037_v51 = vadd.f32 %v827_v49, %v817_v34  ;;  %v829_v53 = vpop.f32.mrb[39].mxu1 }
 0x22f   :  { %2483 = vmatmul.mubr.msk.f32.gmra.mrb[50].mxu1 %vm76_vm0, %v2848_v35  ;;  %2559 = vmatprep.subr.bf16.mxu1 %v2558_v46  ;;  %v1356_v54 = vpop.f32.mrb[56].mxu0  ;;  %v1021_v56 = vsub.f32 %v815_v33, %v829_v53  ;;  %v3017_v59 = vadd.f32 %v1068_v50, %v1052_v55 }
 0x230   :  { %1503 = vmatprep.mubr.f32.mxu1 %v2734_v0  ;;  %2561 = vmatpush1.bf16.msra.mxu1 %v2560_v40  ;;  %v1358_v57 = vpop.f32.mrb[57].mxu0  ;;  %v1069_v58 = vmul.f32 %v1037_v51, %v1037_v51 }
 0x231   :  { %v1053_v60 = vmul.f32 %v1021_v56, %v1021_v56  ;;  %v987_v32 = vpop.f32.mrb[40].mxu1 }
 0x232   :  { %v989_v33 = vpop.f32.mrb[41].mxu1 }
 0x233   :  { %2484 = vmatmul.mubr.msk.f32.gmra.mrb[52].mxu1 %vm76_vm0, %v2856_v39  ;;  %v1362_v61 = vpop.f32.mrb[58].mxu0  ;;  %v3021_v62 = vadd.f32 %v1069_v58, %v1053_v60 }
 0x234   :  { %1509 = vmatprep.mubr.f32.mxu1 %v2734_v0  ;;  %v2564_v1 = vpack.c.bf16 %v1362_v61, %v1356_v54  ;;  %v1364_v3 = vpop.f32.mrb[59].mxu0 }
 0x235   :  { %v2562_v5 = vpack.c.bf16 %v1364_v3, %v1358_v57  ;;  %v993_v41 = vpop.f32.mrb[42].mxu1 }
 0x236   :  { %v995_v42 = vpop.f32.mrb[43].mxu1 }
 0x237   :  { %2485 = vmatmul.mubr.msk.f32.gmra.mrb[54].mxu1 %vm76_vm0, %v2864_v43  ;;  %v1368_v6 = vpop.f32.mrb[60].mxu0  ;;  %2563 = vmatprep.subr.bf16.mxu1 %v2562_v5 }
 0x238   :  { %1580 = vmatprep.mubr.f32.mxu1 %v2734_v0  ;;  %v1370_v8 = vpop.f32.mrb[61].mxu0 }
 0x239   :  { %v999_v48 = vpop.f32.mrb[44].mxu1 }
 0x23a   :  { %v1040_v49 = vadd.f32 %v999_v48, %v989_v33  ;;  %v1001_v50 = vpop.f32.mrb[45].mxu1 }
 0x23b   :  { %2486 = vmatmul.mubr.msk.f32.vlgmr.msra.gmra.mrb[56].mxu1 %vm76_vm0, %v2840_v31  ;;  %v1374_v9 = vpop.f32.mrb[62].mxu0  ;;  %v1024_v53 = vsub.f32 %v987_v32, %v1001_v50  ;;  %v1102_v50 = vand.u32 2147483648, %v2993_v11 }
 0x23c   :  { %1586 = vmatprep.mubr.f32.mxu1 %v2734_v0  ;;  %v2568_v10 = vpack.c.bf16 %v1374_v9, %v1368_v6  ;;  %v1376_v12 = vpop.f32.mrb[63].mxu0  ;;  %2565 = vmatpush1.bf16.msra.mxu1 %v2564_v1  ;;  %v1072_v56 = vmul.f32 %v1040_v49, %v1040_v49 }
 0x23d   :  { %v2566_v14 = vpack.c.bf16 %v1376_v12, %v1370_v8  ;;  %v1056_v58 = vmul.f32 %v1024_v53, %v1024_v53  ;;  %v1005_v60 = vpop.f32.mrb[46].mxu1 }
 0x23e   :  { %v1041_v61 = vadd.f32 %v1005_v60, %v995_v42  ;;  %v1007_v1 = vpop.f32.mrb[47].mxu1 }
 0x23f   :  { %2487 = vmatmul.mubr.msk.f32.gmra.mrb[58].mxu1 %vm76_vm0, %v2848_v35  ;;  %v1380_v15 = vpop.f32.mrb[64].mxu0  ;;  %2567 = vmatprep.subr.bf16.mxu1 %v2566_v14  ;;  %v3071_v3 = vadd.f32 %v1072_v56, %v1056_v58  ;;  %v1025_v5 = vsub.f32 %v993_v41, %v1007_v1 }
 0x240   :  { %v1382_v16 = vpop.f32.mrb[65].mxu0  ;;  %1592 = vmatprep.mubr.f32.mxu1 %v2734_v0  ;;  %v1073_v6 = vmul.f32 %v1041_v61, %v1041_v61 }
 0x241   :  { %v1057_v8 = vmul.f32 %v1025_v5, %v1025_v5 }
 0x243   :  { %v1386_v17 = vpop.f32.mrb[66].mxu0  ;;  %2488 = vmatmul.mubr.msk.f32.gmra.mrb[60].mxu1 %vm76_vm0, %v2856_v39  ;;  %v3079_v9 = vadd.f32 %v1073_v6, %v1057_v8 }
 0x244   :  { %v2572_v18 = vpack.c.bf16 %v1386_v17, %v1380_v15  ;;  %v1388_v19 = vpop.f32.mrb[67].mxu0  ;;  %1598 = vmatprep.mubr.f32.mxu1 %v2734_v0 }
 0x245   :  { %v2570_v20 = vpack.c.bf16 %v1388_v19, %v1382_v16 }
 0x247   :  { %2489 = vmatmul.mubr.msk.f32.gmra.mrb[62].mxu1 %vm76_vm0, %v2864_v43  ;;  %2571 = vmatprep.subr.bf16.mxu0 %v2570_v20  ;;  %v1392_v21 = vpop.f32.mrb[68].mxu0 }
 0x248   :  { %2573 = vmatpush1.bf16.msra.mxu0 %v2572_v18  ;;  %1669 = vmatprep.mubr.f32.mxu1 %v2734_v0  ;;  %v1394_v22 = vpop.f32.mrb[69].mxu0 }
 0x24b   :  { %2490 = vmatmul.mubr.msk.f32.vlgmr.msra.gmra.mrb[64].mxu1 %vm76_vm0, %v2840_v31  ;;  %2498 = vmatmul.mubr.msk.f32.vlgmr.msra.gmra.mrb[80].mxu0 %vm76_vm0, %v2840_v31  ;;  %v1398_v23 = vpop.f32.mrb[70].mxu0 }
 0x24c   :  { %1675 = vmatprep.mubr.f32.mxu1 %v2734_v0  ;;  %1853 = vmatprep.mubr.f32.mxu0 %v2734_v0  ;;  %v2576_v24 = vpack.c.bf16 %v1398_v23, %v1392_v21  ;;  %v1400_v25 = vpop.f32.mrb[71].mxu0 }
 0x24d   :  { %v2574_v26 = vpack.c.bf16 %v1400_v25, %v1394_v22  ;;  %2569 = vmatpush1.bf16.msra.mxu1 %v2568_v10 }
 0x24f   :  { %2491 = vmatmul.mubr.msk.f32.gmra.mrb[66].mxu1 %vm76_vm0, %v2848_v35  ;;  %2499 = vmatmul.mubr.msk.f32.gmra.mrb[82].mxu0 %vm76_vm0, %v2848_v35  ;;  %v1404_v27 = vpop.f32.mrb[72].mxu0 }
 0x250   :  { %v1406_v28 = vpop.f32.mrb[73].mxu0  ;;  %1681 = vmatprep.mubr.f32.mxu1 %v2734_v0  ;;  %1859 = vmatprep.mubr.f32.mxu0 %v2734_v0 }
 0x251   :  { %2575 = vmatprep.subr.bf16.mxu1 %v2574_v26 }
 0x253   :  { %v1410_v34 = vpop.f32.mrb[74].mxu0  ;;  %2492 = vmatmul.mubr.msk.f32.gmra.mrb[68].mxu1 %vm76_vm0, %v2856_v39  ;;  %2500 = vmatmul.mubr.msk.f32.gmra.mrb[84].mxu0 %vm76_vm0, %v2856_v39 }
 0x254   :  { %v2580_v36 = vpack.c.bf16 %v1410_v34, %v1404_v27  ;;  %v1412_v38 = vpop.f32.mrb[75].mxu0  ;;  %1687 = vmatprep.mubr.f32.mxu1 %v2734_v0  ;;  %1865 = vmatprep.mubr.f32.mxu0 %v2734_v0  ;;  %v2595_v27 = vpop.eup %2594 }
 0x255   :  { %v2578_v40 = vpack.c.bf16 %v1412_v38, %v1406_v28  ;;  %v1091_v33 = vmul.f32 %v2595_v27, %v2991_v4  ;;  %v2597_v34 = vpop.eup %2596  ;;  %v1151_v27 = vand.u32 2147483648, %v2987_v52 }
 0x256   :  { %v2599_v38 = vpop.eup %2598 }
 0x257   :  { %2493 = vmatmul.mubr.msk.f32.gmra.mrb[70].mxu1 %vm76_vm0, %v2864_v43  ;;  %2501 = vmatmul.mubr.msk.f32.gmra.mrb[86].mxu0 %vm76_vm0, %v2864_v43  ;;  %v1416_v45 = vpop.f32.mrb[76].mxu0  ;;  %v1093_v49 = vsel %vm1092_vm1, %v2991_v4, %v1091_v33 }
 0x258   :  { %2579 = vmatprep.subr.bf16.mxu0 %v2578_v40  ;;  %1758 = vmatprep.mubr.f32.mxu1 %v2734_v0  ;;  %v1418_v46 = vpop.f32.mrb[77].mxu0  ;;  %v1095_v40 = vand.u32 2147483648, %v2991_v4 }
 0x259   :  { %2581 = vmatpush1.bf16.msra.mxu0 %v2580_v36  ;;  %2025 = vmatprep.mubr.f32.mxu0 %v2734_v0 }
 0x25a   :  { %v3129_v61 = vsel %vm1094_vm3, %v1095_v40, %v1093_v49  ;;  %v1109_v40 = vand.u32 2147483648, %v2995_v30 }
 0x25b   :  { %2494 = vmatmul.mubr.msk.f32.vlgmr.msra.gmra.mrb[72].mxu1 %vm76_vm0, %v2840_v31  ;;  %v1422_v51 = vpop.f32.mrb[78].mxu0 }
 0x25c   :  { %2506 = vmatmul.mubr.msk.f32.vlgmr.msra.gmra.mrb[88].mxu0 %vm76_vm0, %v2840_v31  ;;  %1764 = vmatprep.mubr.f32.mxu1 %v2734_v0  ;;  %v2584_v54 = vpack.c.bf16 %v1422_v51, %v1416_v45  ;;  %v1424_v55 = vpop.f32.mrb[79].mxu0 }
 0x25d   :  { %2031 = vmatprep.mubr.f32.mxu0 %v2734_v0  ;;  %2577 = vmatpush1.bf16.msra.mxu1 %v2576_v24  ;;  %v2582_v57 = vpack.c.bf16 %v1424_v55, %v1418_v46  ;;  %v1098_v46 = vmul.f32 %v2597_v34, %v2993_v11 }
 0x25f   :  { %2495 = vmatmul.mubr.msk.f32.gmra.mrb[74].mxu1 %vm76_vm0, %v2848_v35  ;;  %2583 = vmatprep.subr.bf16.mxu1 %v2582_v57  ;;  %v1147_v57 = vmul.f32 %v2599_v38, %v2987_v52  ;;  %v1100_v8 = vsel %vm1099_vm2, %v2993_v11, %v1098_v46  ;;  %v1158_v38 = vand.u32 2147483648, %v2989_v7  ;;  %v1179_v46 = vand.u32 2147483648, %v2999_v47 }
 0x260   :  { %2507 = vmatmul.mubr.msk.f32.gmra.mrb[90].mxu0 %vm76_vm0, %v2848_v35  ;;  %1770 = vmatprep.mubr.f32.mxu1 %v2734_v0  ;;  %vm1157_vm2 = vcmp.eq.f32.partialorder %v2989_v7, 0.0 }
 0x261   :  { %2037 = vmatprep.mubr.f32.mxu0 %v2734_v0 }
 0x263   :  { %2496 = vmatmul.mubr.msk.f32.gmra.mrb[76].mxu1 %vm76_vm0, %v2856_v39 }
 0x264   :  { %2508 = vmatmul.mubr.msk.f32.gmra.mrb[92].mxu0 %vm76_vm0, %v2856_v39  ;;  %1776 = vmatprep.mubr.f32.mxu1 %v2734_v0 }
 0x265   :  { %2043 = vmatprep.mubr.f32.mxu0 %v2734_v0 }
 0x267   :  { %2497 = vmatmul.mubr.msk.f32.gmra.mrb[78].mxu1 %vm76_vm0, %v2864_v43 }
 0x268   :  { %2509 = vmatmul.mubr.msk.f32.gmra.mrb[94].mxu0 %vm76_vm0, %v2864_v43  ;;  %1936 = vmatprep.mubr.f32.mxu1 %v2734_v0 }
 0x26b   :  { %2502 = vmatmul.mubr.msk.f32.vlgmr.msra.gmra.mrb[80].mxu1 %vm76_vm0, %v2840_v31 }
 0x26c   :  { %1942 = vmatprep.mubr.f32.mxu1 %v2734_v0  ;;  %2585 = vmatpush1.bf16.msra.mxu1 %v2584_v54 }
 0x26f   :  { %2503 = vmatmul.mubr.msk.f32.gmra.mrb[82].mxu1 %vm76_vm0, %v2848_v35 }
 0x270   :  { %1948 = vmatprep.mubr.f32.mxu1 %v2734_v0 }
 0x273   :  { %2504 = vmatmul.mubr.msk.f32.gmra.mrb[84].mxu1 %vm76_vm0, %v2856_v39 }
 0x274   :  { %1954 = vmatprep.mubr.f32.mxu1 %v2734_v0 }
 0x277   :  { %2505 = vmatmul.mubr.msk.f32.gmra.mrb[86].mxu1 %vm76_vm0, %v2864_v43 }
 0x278   :  { %2114 = vmatprep.mubr.f32.mxu1 %v2734_v0 }
 0x27b   :  { %2510 = vmatmul.mubr.msk.f32.vlgmr.msra.gmra.mrb[88].mxu1 %vm76_vm0, %v2840_v31 }
 0x27c   :  { %2120 = vmatprep.mubr.f32.mxu1 %v2734_v0 }
 0x27f   :  { %2511 = vmatmul.mubr.msk.f32.gmra.mrb[90].mxu1 %vm76_vm0, %v2848_v35 }
 0x280   :  { %2126 = vmatprep.mubr.f32.mxu1 %v2734_v0 }
 0x283   :  { %2512 = vmatmul.mubr.msk.f32.gmra.mrb[92].mxu1 %vm76_vm0, %v2856_v39 }
 0x284   :  { %2132 = vmatprep.mubr.f32.mxu1 %v2734_v0 }
 0x287   :  { %2513 = vmatmul.mubr.msk.f32.gmra.mrb[94].mxu1 %vm76_vm0, %v2864_v43  ;;  %vm1176_vm0 = vcmp.eq.f32.partialorder %v2999_v47, inf }
 0x2fe   :  { %v1493_v10 = vpop.f32.mrb[48].mxu1 }
 0x2ff   :  { %v1495_v12 = vpop.f32.mrb[49].mxu1 }
 0x302   :  { %v1499_v14 = vpop.f32.mrb[50].mxu1 }
 0x303   :  { %v1501_v15 = vpop.f32.mrb[51].mxu1 }
 0x306   :  { %v1505_v31 = vpop.f32.mrb[52].mxu1 }
 0x307   :  { %v2155_v16 = vadd.f32 %v1505_v31, %v1495_v12  ;;  %v1507_v17 = vpop.f32.mrb[53].mxu1 }
 0x308   :  { %v2139_v35 = vsub.f32 %v1493_v10, %v1507_v17 }
 0x309   :  { %v2187_v18 = vmul.f32 %v2155_v16, %v2155_v16 }
 0x30a   :  { %v2171_v19 = vmul.f32 %v2139_v35, %v2139_v35  ;;  %v1511_v20 = vpop.f32.mrb[54].mxu1 }
 0x30b   :  { %v2156_v39 = vadd.f32 %v1511_v20, %v1501_v15  ;;  %v1513_v0 = vpop.f32.mrb[55].mxu1 }
 0x30c   :  { %v2203_v21 = vadd.f32 %v2187_v18, %v2171_v19  ;;  %v2140_v22 = vsub.f32 %v1499_v14, %v1513_v0 }
 0x30d   :  { %v2188_v43 = vmul.f32 %v2156_v39, %v2156_v39 }
 0x30e   :  { %2600 = vrsqrt.f32 %v2203_v21  ;;  %v2172_v23 = vmul.f32 %v2140_v22, %v2140_v22  ;;  %v1582_v24 = vpop.f32.mrb[56].mxu1  ;;  %vm2221_vm4 = vcmp.eq.f32.partialorder %v2203_v21, inf  ;;  %v2224_v54 = vand.u32 2147483648, %v2203_v21 }
 0x30f   :  { %v1584_v25 = vpop.f32.mrb[57].mxu1  ;;  %vm2223_vm5 = vcmp.eq.f32.partialorder %v2203_v21, 0.0  ;;  %v3144_v22 = vsel %vm1101_vm6, %v1102_v50, %v1100_v8 }
 0x310   :  { %v2204_v26 = vadd.f32 %v2188_v43, %v2172_v23  ;;  %v1149_v23 = vsel %vm1148_vm9, %v2987_v52, %v1147_v57  ;;  %vm1134_vm9 = vcmp.eq.f32.partialorder %v3007_v29, inf }
 0x312   :  { %2602 = vrsqrt.f32 %v2204_v26  ;;  %v1588_v28 = vpop.f32.mrb[58].mxu1  ;;  %vm2228_vm7 = vcmp.eq.f32.partialorder %v2204_v26, inf  ;;  %v2231_v31 = vand.u32 2147483648, %v2204_v26  ;;  %vm2230_vm8 = vcmp.eq.f32.partialorder %v2204_v26, 0.0 }
 0x313   :  { %v1590_v32 = vpop.f32.mrb[59].mxu1  ;;  %2604 = vrsqrt.f32 %v2989_v7 }
 0x314   :  { %2606 = vrsqrt.f32 %v2995_v30 }
 0x315   :  { %2608 = vrsqrt.f32 %v2997_v44 }
 0x316   :  { %v1594_v36 = vpop.f32.mrb[60].mxu1  ;;  %2610 = vrsqrt.f32 %v2999_v47 }
 0x317   :  { %v2157_v41 = vadd.f32 %v1594_v36, %v1584_v25  ;;  %v1596_v42 = vpop.f32.mrb[61].mxu1 }
 0x318   :  { %v2601_v45 = vpop.eup %2600  ;;  %v2141_v48 = vsub.f32 %v1582_v24, %v1596_v42  ;;  %v3167_v42 = vsel %vm1150_vm10, %v1151_v27, %v1149_v23  ;;  %vm1141_vm10 = vcmp.eq.f32.partialorder %v3011_v37, inf }
 0x319   :  { %v2220_v51 = vmul.f32 %v2601_v45, %v2203_v21  ;;  %v2189_v53 = vmul.f32 %v2157_v41, %v2157_v41  ;;  %v1116_v45 = vand.u32 2147483648, %v2997_v44 }
 0x31a   :  { %v2173_v55 = vmul.f32 %v2141_v48, %v2141_v48  ;;  %v1600_v56 = vpop.f32.mrb[62].mxu1 }
 0x31b   :  { %v2158_v58 = vadd.f32 %v1600_v56, %v1590_v32  ;;  %v1602_v60 = vpop.f32.mrb[63].mxu1  ;;  %v2222_v1 = vsel %vm2221_vm4, %v2203_v21, %v2220_v51  ;;  %v1186_v51 = vand.u32 2147483648, %v3001_v63 }
 0x31c   :  { %v2603_v5 = vpop.eup %2602  ;;  %v3131_v4 = vadd.f32 %v2189_v53, %v2173_v55  ;;  %v2142_v6 = vsub.f32 %v1588_v28, %v1602_v60  ;;  %v3136_v10 = vsel %vm2223_vm5, %v2224_v54, %v2222_v1  ;;  %vm1178_vm5 = vcmp.eq.f32.partialorder %v2999_v47, 0.0 }
 0x31d   :  { %v2227_v12 = vmul.f32 %v2603_v5, %v2204_v26  ;;  %v2190_v14 = vmul.f32 %v2158_v58, %v2158_v58  ;;  %v2331_v15 = vsub.f32 %v3129_v61, %v3136_v10  ;;  %v2605_v18 = vpop.eup %2604 }
 0x31e   :  { %2612 = vrsqrt.f32 %v3131_v4  ;;  %v2174_v16 = vmul.f32 %v2142_v6, %v2142_v6  ;;  %v1671_v17 = vpop.f32.mrb[64].mxu1  ;;  %v1849_v35 = vpop.f32.mrb[80].mxu0  ;;  %v1154_v28 = vmul.f32 %v2605_v18, %v2989_v7  ;;  %vm2235_vm1 = vcmp.eq.f32.partialorder %v3131_v4, inf }
 0x31f   :  { %v1673_v19 = vpop.f32.mrb[65].mxu1  ;;  %v1851_v20 = vpop.f32.mrb[81].mxu0  ;;  %v2229_v39 = vsel %vm2228_vm7, %v2204_v26, %v2227_v12  ;;  %2614 = vrsqrt.f32 %v3001_v63  ;;  %vm2237_vm3 = vcmp.eq.f32.partialorder %v3131_v4, 0.0  ;;  %vm1120_vm7 = vcmp.eq.f32.partialorder %v3003_v2, inf }
 0x320   :  { %v2607_v0 = vpop.eup %2606  ;;  %v3142_v21 = vadd.f32 %v2190_v14, %v2174_v16  ;;  %v3147_v11 = vsel %vm2230_vm8, %v2231_v31, %v2229_v39  ;;  %v3177_v50 = vsel %vm1155_vm11, %v2989_v7, %v1154_v28  ;;  %v2238_v14 = vand.u32 2147483648, %v3131_v4 }
 0x321   :  { %v2609_v43 = vpop.eup %2608  ;;  %v2332_v24 = vsub.f32 %v3144_v22, %v3147_v11  ;;  %v1105_v33 = vmul.f32 %v2607_v0, %v2995_v30  ;;  %vm1127_vm8 = vcmp.eq.f32.partialorder %v3005_v13, inf  ;;  %v1123_v7 = vand.u32 2147483648, %v3003_v2 }
 0x322   :  { %2616 = vrsqrt.f32 %v3142_v21  ;;  %v1677_v25 = vpop.f32.mrb[66].mxu1  ;;  %v1855_v26 = vpop.f32.mrb[82].mxu0  ;;  %v1112_v41 = vmul.f32 %v2609_v43, %v2997_v44  ;;  %vm2242_vm4 = vcmp.eq.f32.partialorder %v3142_v21, inf  ;;  %vm2244_vm6 = vcmp.eq.f32.partialorder %v3142_v21, 0.0 }
 0x323   :  { %v2611_v32 = vpop.eup %2610  ;;  %2618 = vrsqrt.f32 %v3003_v2  ;;  %v1679_v34 = vpop.f32.mrb[67].mxu1  ;;  %v1107_v57 = vsel %vm1106_vm12, %v2995_v30, %v1105_v33  ;;  %v1130_v11 = vand.u32 2147483648, %v3005_v13  ;;  %vm1122_vm12 = vcmp.eq.f32.partialorder %v3003_v2, 0.0 }
 0x324   :  { %v1857_v36 = vpop.f32.mrb[83].mxu0  ;;  %2620 = vrsqrt.f32 %v3005_v13  ;;  %v3180_v52 = vmul.f32 %v2611_v32, %v2999_v47  ;;  %v1114_v5 = vsel %vm1113_vm13, %v2997_v44, %v1112_v41  ;;  %vm1129_vm13 = vcmp.eq.f32.partialorder %v3005_v13, 0.0 }
 0x325   :  { %2622 = vrsqrt.f32 %v3007_v29 }
 0x326   :  { %2624 = vrsqrt.f32 %v3011_v37  ;;  %v1683_v48 = vpop.f32.mrb[68].mxu1  ;;  %v1861_v49 = vpop.f32.mrb[84].mxu0 }
 0x327   :  { %v2159_v53 = vadd.f32 %v1683_v48, %v1673_v19  ;;  %v2163_v54 = vadd.f32 %v1861_v49, %v1851_v20  ;;  %v1685_v55 = vpop.f32.mrb[69].mxu1  ;;  %v1863_v56 = vpop.f32.mrb[85].mxu0 }
 0x328   :  { %v2613_v58 = vpop.eup %2612  ;;  %v2143_v60 = vsub.f32 %v1671_v17, %v1685_v55  ;;  %v2147_v1 = vsub.f32 %v1849_v35, %v1863_v56 }
 0x329   :  { %v2234_v6 = vmul.f32 %v2613_v58, %v3131_v4  ;;  %v2191_v8 = vmul.f32 %v2159_v53, %v2159_v53  ;;  %v2195_v12 = vmul.f32 %v2163_v54, %v2163_v54  ;;  %v2615_v18 = vpop.eup %2614 }
 0x32a   :  { %v2175_v31 = vmul.f32 %v2143_v60, %v2143_v60  ;;  %v2179_v16 = vmul.f32 %v2147_v1, %v2147_v1  ;;  %v1689_v17 = vpop.f32.mrb[70].mxu1  ;;  %v1867_v35 = vpop.f32.mrb[86].mxu0  ;;  %v1110_v1 = vsel %vm1108_vm14, %v1109_v40, %v1107_v57  ;;  %v1177_v40 = vsel %vm1176_vm0, %v2999_v47, %v3180_v52 }
 0x32b   :  { %v2160_v19 = vadd.f32 %v1689_v17, %v1679_v34  ;;  %v2164_v20 = vadd.f32 %v1867_v35, %v1857_v36  ;;  %v1691_v39 = vpop.f32.mrb[71].mxu1  ;;  %v1869_v0 = vpop.f32.mrb[87].mxu0  ;;  %v2236_v43 = vsel %vm2235_vm1, %v3131_v4, %v2234_v6  ;;  %v2245_v34 = vand.u32 2147483648, %v3142_v21 }
 0x32c   :  { %v2617_v23 = vpop.eup %2616  ;;  %v3201_v27 = vadd.f32 %v2191_v8, %v2175_v31  ;;  %v3203_v28 = vadd.f32 %v2195_v12, %v2179_v16  ;;  %v2144_v32 = vsub.f32 %v1677_v25, %v1691_v39  ;;  %v2148_v33 = vsub.f32 %v1855_v26, %v1869_v0 }
 0x32d   :  { %v2619_v41 = vpop.eup %2618  ;;  %v2241_v48 = vmul.f32 %v2617_v23, %v3142_v21  ;;  %v2192_v36 = vmul.f32 %v2160_v19, %v2160_v19  ;;  %v2196_v49 = vmul.f32 %v2164_v20, %v2164_v20  ;;  %v2239_v58 = vsel %vm2237_vm3, %v2238_v14, %v2236_v43 }
 0x32e   :  { %v2621_v53 = vpop.eup %2620  ;;  %2626 = vrsqrt.f32 %v3201_v27  ;;  %v2176_v54 = vmul.f32 %v2144_v32, %v2144_v32  ;;  %v2180_v55 = vmul.f32 %v2148_v33, %v2148_v33  ;;  %v1760_v56 = vpop.f32.mrb[72].mxu1  ;;  %v1117_v31 = vsel %vm1115_vm15, %v1116_v45, %v1114_v5 }
 0x32f   :  { %v2623_v25 = vpop.eup %2622  ;;  %2628 = vrsqrt.f32 %v3203_v28  ;;  %v2027_v26 = vpop.f32.mrb[88].mxu0  ;;  %v2243_v6 = vsel %vm2242_vm4, %v3142_v21, %v2241_v48  ;;  %v1119_v30 = vmul.f32 %v2619_v41, %v3003_v2  ;;  %v2333_v21 = vsub.f32 %v1110_v1, %v2239_v58 }
 0x330   :  { %v1762_v60 = vpop.f32.mrb[73].mxu1  ;;  %v2625_v8 = vpop.eup %2624  ;;  %v3220_v12 = vadd.f32 %v2192_v36, %v2176_v54  ;;  %v3222_v4 = vadd.f32 %v2196_v49, %v2180_v55  ;;  %v2246_v16 = vsel %vm2244_vm6, %v2245_v34, %v2243_v6  ;;  %v1126_v17 = vmul.f32 %v2621_v53, %v3005_v13 }
 0x331   :  { %v2029_v14 = vpop.f32.mrb[89].mxu0  ;;  %v2334_v57 = vsub.f32 %v1117_v31, %v2246_v16  ;;  %v1133_v5 = vmul.f32 %v2623_v25, %v3007_v29  ;;  %v3243_v52 = vsel %vm1157_vm2, %v1158_v38, %v3177_v50  ;;  %v2347_v19 = vand.u32 2147483647, %v2331_v15 }
 0x332   :  { %2630 = vrsqrt.f32 %v3220_v12  ;;  %v1766_v35 = vpop.f32.mrb[74].mxu1  ;;  %v2348_v20 = vand.u32 2147483647, %v2332_v24  ;;  %v2349_v0 = vand.u32 2147483647, %v2333_v21  ;;  %v3254_v23 = vsel %vm1120_vm7, %v3003_v2, %v1119_v30 }
 0x333   :  { %v2033_v44 = vpop.f32.mrb[90].mxu0  ;;  %v1768_v45 = vpop.f32.mrb[75].mxu1  ;;  %2632 = vrsqrt.f32 %v3222_v4  ;;  %v2350_v43 = vand.u32 2147483647, %v2334_v57  ;;  %v3261_v61 = vsel %vm1178_vm5, %v1179_v46, %v1177_v40  ;;  %v3264_v10 = vmul.f32 %v2615_v18, %v3001_v63 }
 0x334   :  { %v2035_v39 = vpop.f32.mrb[91].mxu0  ;;  %v3269_v22 = vsel %vm1127_vm8, %v3005_v13, %v1126_v17  ;;  %v3272_v24 = vadd.f32 %v2349_v0, %v2347_v19  ;;  %v3277_v46 = vsel %vm1134_vm9, %v3007_v29, %v1133_v5  ;;  %v1137_v18 = vand.u32 2147483648, %v3007_v29 }
 0x335   :  { %v3274_v38 = vadd.f32 %v2350_v43, %v2348_v20  ;;  %v3281_v33 = vmul.f32 %v2625_v8, %v3011_v37  ;;  %v1144_v49 = vand.u32 2147483648, %v3011_v37  ;;  %vm2249_vm11 = vcmp.eq.f32.partialorder %v3201_v27, inf }
 0x336   :  { %v1772_v15 = vpop.f32.mrb[76].mxu1  ;;  %vm2251_vm14 = vcmp.eq.f32.partialorder %v3201_v27, 0.0  ;;  %v2252_v58 = vand.u32 2147483648, %v3201_v27  ;;  %vm2277_vm15 = vcmp.eq.f32.partialorder %v3203_v28, inf  ;;  %vm2279_vm0 = vcmp.eq.f32.partialorder %v3203_v28, 0.0 }
 0x337   :  { %v2161_v50 = vadd.f32 %v1772_v15, %v1762_v60  ;;  %v2039_v32 = vpop.f32.mrb[92].mxu0  ;;  %v1774_v47 = vpop.f32.mrb[77].mxu1  ;;  %v2280_v1 = vand.u32 2147483648, %v3203_v28  ;;  %vm1136_vm1 = vcmp.eq.f32.partialorder %v3007_v29, 0.0  ;;  %vm2256_vm2 = vcmp.eq.f32.partialorder %v3220_v12, inf }
 0x338   :  { %v2627_v41 = vpop.eup %2626  ;;  %v2167_v48 = vadd.f32 %v2039_v32, %v2029_v14  ;;  %v2145_v34 = vsub.f32 %v1760_v56, %v1774_v47  ;;  %v2041_v36 = vpop.f32.mrb[93].mxu0  ;;  %vm1183_vm3 = vcmp.eq.f32.partialorder %v3001_v63, inf  ;;  %vm2284_vm4 = vcmp.eq.f32.partialorder %v3222_v4, inf }
 0x339   :  { %v2629_v53 = vpop.eup %2628  ;;  %v2193_v54 = vmul.f32 %v2161_v50, %v2161_v50  ;;  %v2151_v55 = vsub.f32 %v2027_v26, %v2041_v36  ;;  %v2248_v6 = vmul.f32 %v2627_v41, %v3201_v27  ;;  %vm2258_vm5 = vcmp.eq.f32.partialorder %v3220_v12, 0.0 }
 0x33a   :  { %v2199_v56 = vmul.f32 %v2167_v48, %v2167_v48  ;;  %v2177_v25 = vmul.f32 %v2145_v34, %v2145_v34  ;;  %v1778_v60 = vpop.f32.mrb[78].mxu1  ;;  %v2276_v17 = vmul.f32 %v2629_v53, %v3203_v28  ;;  %v2287_v34 = vand.u32 2147483648, %v3222_v4 }
 0x33b   :  { %v2183_v26 = vmul.f32 %v2151_v55, %v2151_v55  ;;  %v2162_v8 = vadd.f32 %v1778_v60, %v1768_v45  ;;  %v2045_v14 = vpop.f32.mrb[94].mxu0  ;;  %v1780_v31 = vpop.f32.mrb[79].mxu1  ;;  %v2250_v47 = vsel %vm2249_vm11, %v3201_v27, %v2248_v6  ;;  %vm2286_vm6 = vcmp.eq.f32.partialorder %v3222_v4, 0.0 }
 0x33c   :  { %v2631_v16 = vpop.eup %2630  ;;  %v3296_v30 = vadd.f32 %v2193_v54, %v2177_v25  ;;  %v2168_v40 = vadd.f32 %v2045_v14, %v2035_v39  ;;  %v2146_v21 = vsub.f32 %v1766_v35, %v1780_v31  ;;  %v2047_v57 = vpop.f32.mrb[95].mxu0  ;;  %v2259_v39 = vand.u32 2147483648, %v3220_v12 }
 0x33d   :  { %v2255_v5 = vmul.f32 %v2631_v16, %v3220_v12  ;;  %v3300_v19 = vadd.f32 %v2199_v56, %v2183_v26  ;;  %v2194_v20 = vmul.f32 %v2162_v8, %v2162_v8  ;;  %v2152_v45 = vsub.f32 %v2033_v44, %v2047_v57  ;;  %v2633_v0 = vpop.eup %2632 }
 0x33e   :  { %2634 = vrsqrt.f32 %v3296_v30  ;;  %v2200_v43 = vmul.f32 %v2168_v40, %v2168_v40  ;;  %v2178_v15 = vmul.f32 %v2146_v21, %v2146_v21  ;;  %v1938_v50 = vpop.f32.mrb[80].mxu1  ;;  %v2278_v48 = vsel %vm2277_vm15, %v3203_v28, %v2276_v17 }
 0x33f   :  { %2636 = vrsqrt.f32 %v3300_v19  ;;  %v2184_v35 = vmul.f32 %v2152_v45, %v2152_v45  ;;  %v1940_v32 = vpop.f32.mrb[81].mxu1  ;;  %v2257_v44 = vsel %vm2256_vm2, %v3220_v12, %v2255_v5  ;;  %v2283_v53 = vmul.f32 %v2633_v0, %v3222_v4 }
 0x340   :  { %v3312_v41 = vadd.f32 %v2194_v20, %v2178_v15  ;;  %v2253_v55 = vsel %vm2251_vm14, %v2252_v58, %v2250_v47  ;;  %v2260_v56 = vsel %vm2258_vm5, %v2259_v39, %v2257_v44  ;;  %v3329_v25 = vsel %vm2279_vm0, %v2280_v1, %v2278_v48 }
 0x341   :  { %v3319_v36 = vadd.f32 %v2200_v43, %v2184_v35  ;;  %v1142_v12 = vsel %vm1141_vm10, %v3011_v37, %v3281_v33  ;;  %vm1143_vm7 = vcmp.eq.f32.partialorder %v3011_v37, 0.0  ;;  %v2285_v6 = vsel %vm2284_vm4, %v3222_v4, %v2283_v53 }
 0x342   :  { %2638 = vrsqrt.f32 %v3312_v41  ;;  %v1944_v54 = vpop.f32.mrb[82].mxu1  ;;  %v1124_v27 = vsel %vm1122_vm12, %v1123_v7, %v3254_v23  ;;  %v1131_v28 = vsel %vm1129_vm13, %v1130_v11, %v3269_v22  ;;  %v3349_v58 = vsel %vm2286_vm6, %v2287_v34, %v2285_v6 }
 0x343   :  { %2640 = vrsqrt.f32 %v3319_v36  ;;  %v1946_v60 = vpop.f32.mrb[83].mxu1  ;;  %v2335_v33 = vsub.f32 %v1124_v27, %v2253_v55  ;;  %v2336_v1 = vsub.f32 %v1131_v28, %v2260_v56  ;;  %v2339_v4 = vsub.f32 %v3167_v42, %v3329_v25 }
 0x344   :  { %2642 = vrsqrt.f32 %v3017_v59  ;;  %v2340_v26 = vsub.f32 %v3243_v52, %v3349_v58  ;;  %v1138_v13 = vsel %vm1136_vm1, %v1137_v18, %v3277_v46  ;;  %v3363_v23 = vsel %vm1143_vm7, %v1144_v49, %v1142_v12 }
 0x345   :  { %2644 = vrsqrt.f32 %v3021_v62  ;;  %v1184_v7 = vsel %vm1183_vm3, %v3001_v63, %v3264_v10  ;;  %vm2263_vm8 = vcmp.eq.f32.partialorder %v3296_v30, inf  ;;  %v2351_v8 = vand.u32 2147483647, %v2335_v33 }
 0x346   :  { %v1950_v2 = vpop.f32.mrb[84].mxu1  ;;  %v2352_v14 = vand.u32 2147483647, %v2336_v1  ;;  %vm2265_vm9 = vcmp.eq.f32.partialorder %v3296_v30, 0.0  ;;  %vm2305_vm10 = vcmp.eq.f32.partialorder %v3300_v19, inf  ;;  %v2308_v29 = vand.u32 2147483648, %v3300_v19 }
 0x347   :  { %v2165_v22 = vadd.f32 %v1950_v2, %v1940_v32  ;;  %v1952_v11 = vpop.f32.mrb[85].mxu1  ;;  %v2366_v10 = vadd.f32 %v3272_v24, %v2351_v8  ;;  %v2266_v57 = vand.u32 2147483648, %v3296_v30  ;;  %vm2307_vm11 = vcmp.eq.f32.partialorder %v3300_v19, 0.0 }
 0x348   :  { %v2635_v31 = vpop.eup %2634  ;;  %v2149_v16 = vsub.f32 %v1938_v50, %v1952_v11  ;;  %v2373_v49 = vadd.f32 %v3274_v38, %v2352_v14  ;;  %vm2270_vm12 = vcmp.eq.f32.partialorder %v3312_v41, inf  ;;  %vm2272_vm13 = vcmp.eq.f32.partialorder %v3312_v41, 0.0 }
 0x349   :  { %v2637_v37 = vpop.eup %2636  ;;  %v2197_v46 = vmul.f32 %v2165_v22, %v2165_v22  ;;  %v2262_v18 = vmul.f32 %v2635_v31, %v3296_v30  ;;  %v2273_v53 = vand.u32 2147483648, %v3312_v41  ;;  %vm2312_vm14 = vcmp.eq.f32.partialorder %v3319_v36, inf }
 0x34a   :  { %v2181_v40 = vmul.f32 %v2149_v16, %v2149_v16  ;;  %v1956_v21 = vpop.f32.mrb[86].mxu1  ;;  %v2304_v17 = vmul.f32 %v2637_v37, %v3300_v19  ;;  %v2315_v55 = vand.u32 2147483648, %v3319_v36  ;;  %vm2314_vm15 = vcmp.eq.f32.partialorder %v3319_v36, 0.0 }
 0x34b   :  { %v2166_v5 = vadd.f32 %v1956_v21, %v1946_v60  ;;  %v1958_v20 = vpop.f32.mrb[87].mxu1  ;;  %v2264_v45 = vsel %vm2263_vm8, %v3296_v30, %v2262_v18  ;;  %vm1185_vm0 = vcmp.eq.f32.partialorder %v3001_v63, 0.0  ;;  %v2355_v8 = vand.u32 2147483647, %v2339_v4 }
 0x34c   :  { %v2639_v24 = vpop.eup %2638  ;;  %v3384_v38 = vadd.f32 %v2197_v46, %v2181_v40  ;;  %v2150_v0 = vsub.f32 %v1944_v54, %v1958_v20  ;;  %v2267_v43 = vsel %vm2265_vm9, %v2266_v57, %v2264_v45  ;;  %v2306_v15 = vsel %vm2305_vm10, %v3300_v19, %v2304_v17 }
 0x34d   :  { %v2641_v50 = vpop.eup %2640  ;;  %v2198_v39 = vmul.f32 %v2166_v5, %v2166_v5  ;;  %v2269_v35 = vmul.f32 %v2639_v24, %v3312_v41  ;;  %v3392_v32 = vsel %vm2307_vm11, %v2308_v29, %v2306_v15  ;;  %v2337_v47 = vsub.f32 %v1138_v13, %v2267_v43 }
 0x34e   :  { %v2643_v44 = vpop.eup %2642  ;;  %2646 = vrsqrt.f32 %v3384_v38  ;;  %v2182_v48 = vmul.f32 %v2150_v0, %v2150_v0  ;;  %v2116_v34 = vpop.f32.mrb[88].mxu1  ;;  %v2311_v54 = vmul.f32 %v2641_v50, %v3319_v36  ;;  %v2343_v56 = vsub.f32 %v3261_v61, %v3392_v32 }
 0x34f   :  { %v2118_v30 = vpop.f32.mrb[89].mxu1  ;;  %v2271_v19 = vsel %vm2270_vm12, %v3312_v41, %v2269_v35  ;;  %v2645_v60 = vpop.eup %2644  ;;  %v2353_v27 = vand.u32 2147483647, %v2337_v47  ;;  %v1161_v2 = vmul.f32 %v2643_v44, %v3017_v59  ;;  %v3416_v13 = vsel %vm1185_vm0, %v1186_v51, %v1184_v7 }
 0x350   :  { %v3404_v12 = vadd.f32 %v2198_v39, %v2182_v48  ;;  %v2274_v6 = vsel %vm2272_vm13, %v2273_v53, %v2271_v19  ;;  %v2313_v28 = vsel %vm2312_vm14, %v3319_v36, %v2311_v54  ;;  %vm1162_vm1 = vcmp.eq.f32.partialorder %v3017_v59, inf }
 0x351   :  { %v2338_v33 = vsub.f32 %v3363_v23, %v2274_v6  ;;  %v2316_v22 = vsel %vm2314_vm15, %v2315_v55, %v2313_v28  ;;  %v2367_v14 = vadd.f32 %v2366_v10, %v2353_v27  ;;  %v2356_v23 = vand.u32 2147483647, %v2340_v26 }
 0x352   :  { %2648 = vrsqrt.f32 %v3404_v12  ;;  %v2122_v1 = vpop.f32.mrb[90].mxu1  ;;  %v2344_v36 = vsub.f32 %v3416_v13, %v2316_v22  ;;  %v1165_v7 = vand.u32 2147483648, %v3017_v59  ;;  %v1163_v37 = vsel %vm1162_vm1, %v3017_v59, %v1161_v2 }
 0x353   :  { %v2124_v41 = vpop.f32.mrb[91].mxu1  ;;  %v2354_v11 = vand.u32 2147483647, %v2338_v33  ;;  %v2368_v31 = vadd.f32 %v2367_v14, %v2355_v8  ;;  %vm1164_vm2 = vcmp.eq.f32.partialorder %v3017_v59, 0.0  ;;  %2650 = vrsqrt.f32 %v3071_v3 }
 0x354   :  { %v1168_v46 = vmul.f32 %v2645_v60, %v3021_v62  ;;  %2652 = vrsqrt.f32 %v3079_v9  ;;  %vm1169_vm3 = vcmp.eq.f32.partialorder %v3021_v62, inf  ;;  %v1166_v10 = vsel %vm1164_vm2, %v1165_v7, %v1163_v37 }
 0x355   :  { %v2374_v63 = vadd.f32 %v2373_v49, %v2354_v11  ;;  %vm2291_vm4 = vcmp.eq.f32.partialorder %v3384_v38, inf  ;;  %v2294_v59 = vand.u32 2147483648, %v3384_v38  ;;  %v1172_v21 = vand.u32 2147483648, %v3021_v62 }
 0x356   :  { %v2128_v51 = vpop.f32.mrb[92].mxu1  ;;  %vm2293_vm5 = vcmp.eq.f32.partialorder %v3384_v38, 0.0  ;;  %v1170_v45 = vsel %vm1169_vm3, %v3021_v62, %v1168_v46  ;;  %vm1171_vm6 = vcmp.eq.f32.partialorder %v3021_v62, 0.0  ;;  %vm2298_vm7 = vcmp.eq.f32.partialorder %v3404_v12, inf }
 0x357   :  { %v2169_v16 = vadd.f32 %v2128_v51, %v2118_v30  ;;  %v2130_v29 = vpop.f32.mrb[93].mxu1  ;;  %v2375_v42 = vadd.f32 %v2374_v63, %v2356_v23  ;;  %v2301_v39 = vand.u32 2147483648, %v3404_v12  ;;  %vm2300_vm8 = vcmp.eq.f32.partialorder %v3404_v12, 0.0 }
 0x358   :  { %v2647_v25 = vpop.eup %2646  ;;  %v2153_v4 = vsub.f32 %v2116_v34, %v2130_v29  ;;  %v1173_v44 = vsel %vm1171_vm6, %v1172_v21, %v1170_v45  ;;  %v2359_v62 = vand.u32 2147483647, %v2343_v56  ;;  %v2360_v6 = vand.u32 2147483647, %v2344_v36 }
 0x359   :  { %v2201_v52 = vmul.f32 %v2169_v16, %v2169_v16  ;;  %v2290_v58 = vmul.f32 %v2647_v25, %v3384_v38  ;;  %vm1190_vm9 = vcmp.eq.f32.partialorder %v3071_v3, inf  ;;  %v1193_v33 = vand.u32 2147483648, %v3071_v3 }
 0x35a   :  { %v2185_v26 = vmul.f32 %v2153_v4, %v2153_v4  ;;  %v2134_v18 = vpop.f32.mrb[94].mxu1  ;;  %vm1192_vm10 = vcmp.eq.f32.partialorder %v3071_v3, 0.0  ;;  %vm1197_vm11 = vcmp.eq.f32.partialorder %v3079_v9, inf  ;;  %v1200_v22 = vand.u32 2147483648, %v3079_v9 }
 0x35b   :  { %v2170_v49 = vadd.f32 %v2134_v18, %v2124_v41  ;;  %v2136_v40 = vpop.f32.mrb[95].mxu1  ;;  %v2292_v57 = vsel %vm2291_vm4, %v3384_v38, %v2290_v58  ;;  %vm1199_vm14 = vcmp.eq.f32.partialorder %v3079_v9, 0.0  ;;  %vm2400_vm1 = vcmask 0  }
 0x35c   :  { %v2649_v17 = vpop.eup %2648  ;;  %v2217_v5 = vadd.f32 %v2201_v52, %v2185_v26  ;;  %v2154_v20 = vsub.f32 %v2122_v1, %v2136_v40  ;;  %v2295_v24 = vsel %vm2293_vm5, %v2294_v59, %v2292_v57 }
 0x35d   :  { %v2202_v0 = vmul.f32 %v2170_v49, %v2170_v49  ;;  %v2297_v43 = vmul.f32 %v2649_v17, %v3404_v12  ;;  %v2341_v15 = vsub.f32 %v1166_v10, %v2295_v24  ;;  %v2651_v30 = vpop.eup %2650 }
 0x35e   :  { %2654 = vrsqrt.f32 %v2217_v5  ;;  %v2186_v50 = vmul.f32 %v2154_v20, %v2154_v20  ;;  %v2653_v19 = vpop.eup %2652  ;;  %v1189_v60 = vmul.f32 %v2651_v30, %v3071_v3  ;;  %vm2319_vm12 = vcmp.eq.f32.partialorder %v2217_v5, inf }
 0x35f   :  { %v2299_v38 = vsel %vm2298_vm7, %v3404_v12, %v2297_v43  ;;  %v2357_v35 = vand.u32 2147483647, %v2341_v15  ;;  %v1196_v61 = vmul.f32 %v2653_v19, %v3079_v9  ;;  %v2322_v56 = vand.u32 2147483648, %v2217_v5 }
 0x360   :  { %v2218_v47 = vadd.f32 %v2202_v0, %v2186_v50  ;;  %v2302_v48 = vsel %vm2300_vm8, %v2301_v39, %v2299_v38  ;;  %v1191_v1 = vsel %vm1190_vm9, %v3071_v3, %v1189_v60  ;;  %vm2321_vm13 = vcmp.eq.f32.partialorder %v2217_v5, 0.0 }
 0x361   :  { %v2342_v34 = vsub.f32 %v1173_v44, %v2302_v48  ;;  %v2369_v53 = vadd.f32 %v2368_v31, %v2357_v35  ;;  %v1194_v41 = vsel %vm1192_vm10, %v1193_v33, %v1191_v1  ;;  %v1198_v8 = vsel %vm1197_vm11, %v3079_v9, %v1196_v61 }
 0x362   :  { %2656 = vrsqrt.f32 %v2218_v47  ;;  %vm2326_vm15 = vcmp.eq.f32.partialorder %v2218_v47, inf  ;;  %v2329_v36 = vand.u32 2147483648, %v2218_v47  ;;  %vm2328_vm0 = vcmp.eq.f32.partialorder %v2218_v47, 0.0 }
 0x363   :  { %v2358_v54 = vand.u32 2147483647, %v2342_v34  ;;  %v2370_v55 = vadd.f32 %v2369_v53, %v2359_v62  ;;  %v1201_v63 = vsel %vm1199_vm14, %v1200_v22, %v1198_v8 }
 0x365   :  { %v2376_v27 = vadd.f32 %v2375_v42, %v2358_v54 }
 0x367   :  { %v2377_v12 = vadd.f32 %v2376_v27, %v2360_v6 }
 0x368   :  { %v2655_v28 = vpop.eup %2654 }
 0x369   :  { %v2318_v32 = vmul.f32 %v2655_v28, %v2217_v5 }
 0x36b   :  { %v2320_v2 = vsel %vm2319_vm12, %v2217_v5, %v2318_v32 }
 0x36c   :  { %v2657_v13 = vpop.eup %2656  ;;  %v2323_v11 = vsel %vm2321_vm13, %v2322_v56, %v2320_v2 }
 0x36d   :  { %v2325_v14 = vmul.f32 %v2657_v13, %v2218_v47  ;;  %v2345_v3 = vsub.f32 %v1194_v41, %v2323_v11 }
 0x36f   :  { %v2327_v23 = vsel %vm2326_vm15, %v2218_v47, %v2325_v14  ;;  %v2361_v31 = vand.u32 2147483647, %v2345_v3 }
 0x370   :  { %v2330_v51 = vsel %vm2328_vm0, %v2329_v36, %v2327_v23 }
 0x371   :  { %v2346_v7 = vsub.f32 %v1201_v63, %v2330_v51  ;;  %v2371_v16 = vadd.f32 %v2370_v55, %v2361_v31 }
 0x373   :  { %v2362_v29 = vand.u32 2147483647, %v2346_v7 }
 0x375   :  { %v2378_v37 = vadd.f32 %v2377_v12, %v2362_v29 }
 0x377   :  { %v2388_v42 = vadd.f32 %v2378_v37, %v2371_v16 }
 0x379   :  { %2389 = vadd.xlane.f32.xlu0 %v2388_v42 }
 0x406   :  { %v2390_v25 = vpop.xlane.xlu0 %2389 }
 0x407   :  { %v2391_v4 = vrot.slane %v2390_v25, 4 }
 0x409   :  { %v2392_v46 = vadd.f32 %v2391_v4, %v2390_v25 }
 0x40b   :  { %v2393_v52 = vrot.slane %v2392_v46, 2 }
 0x40d   :  { %v2394_v9 = vadd.f32 %v2393_v52, %v2392_v46 }
 0x40f   :  { %v2395_v58 = vrot.slane %v2394_v9, 1 }
 0x411   :  { %v2396_v26 = vadd.f32 %v2395_v58, %v2394_v9 }
 0x413   :  { %2586 = vpush %v2396_v26 }
 0x444   :  { %s2587_s29 = spop %2586 }
 0x445   :  { %v2398_v18 = vstv %s2587_s29 }
 0x446   :  { %v2399_v10 = vmul.f32 0.00086805556, %v2398_v18 }
 0x448   :  { %2401 = vst.msk [vmem:[#allocation8] sm:$0x1] %vm2400_vm1, %v2399_v10 }
 0x449   :  { %2713 = shalt.err (!%p2710_p6)
}
 0x44a   :  { %s2714_s8 = scalar_lea.hbm %s3475_s4, 16 }
 0x44b   :  { %p2715_p7 = scmp.ne.s32.totalorder %s3475_s4, %s2714_s8  ;;  %p2718_p8 = scmp.lt.u32.totalorder %s2714_s8, %s3475_s4 }
 0x44d   :  { %p2720_p9 = pnand %p2718_p8, %p2715_p7 }
 0x44f   :  { %2723 = shalt.err (!%p2720_p9)
}
 0x450   :  { %2411 = dma.vmem_to_hbm [thread:$0]  %s2409_s28, 16, %s3475_s4, [#allocation5]  }
 0x451   :  { %2728 = dma.done.wait [#allocation5], 16  }
 0x452   :  { %2729 = vsyncadd [#allocation5], 4294967280 }
 0x453   :  { %2415 = vsyncpa [#allocation4], 1 }
 0x454   :  { %2416 = vsyncpa [#allocation7], 1 }
 0x455   :  { %2417 = vsyncpa [#allocation5], 1 }

</bundles_post_ra>
